<compile_context>
chip_gen: v7x
topology: tpu7x:2x2x1
jax: 0.10.0
libtpu: 0.0.40
codegen_flags: <defaults>
</compile_context>

<pallas_src>
import math
from functools import partial

import jax
import jax.numpy as jnp
from jax import lax
from jax.experimental import pallas as pl
from jax.experimental.pallas import tpu as pltpu

# ---- real model sizes -------------------------------------------------------
B, S, H, FF, C, VOCAB = 2, 8, 32, 64, 9, 1000   # batch, seq, hidden, ffn, classes, vocab
N = B * S                                       # flattened tokens
# ---- lane-dense padded sizes (last dim = 128 lanes) -------------------------
HP, FP, CP = 128, 128, 128

_VMEM = pl.BlockSpec(memory_space=pltpu.MemorySpace.VMEM)
_SMEM = pl.BlockSpec(memory_space=pltpu.MemorySpace.SMEM)


# ---------------------------------------------------------------------------
# Fused kernel: encoder layer -> (dropout=id) -> classifier [-> CE loss]
# All activations are (N, 128) f32 slabs; padded columns stay exactly 0.
# ---------------------------------------------------------------------------
def _fused_kernel(*refs, with_loss: bool):
    if with_loss:
        (x_ref, bias_ref,
         wq_ref, bq_ref, wk_ref, bk_ref, wv_ref, bv_ref,
         wo_ref, bo_ref, g1_ref, be1_ref,
         w1_ref, b1_ref, w2_ref, b2_ref, g2_ref, be2_ref,
         cw_ref, cb_ref, labels_ref,
         logits_ref, loss_ref) = refs
    else:
        (x_ref, bias_ref,
         wq_ref, bq_ref, wk_ref, bk_ref, wv_ref, bv_ref,
         wo_ref, bo_ref, g1_ref, be1_ref,
         w1_ref, b1_ref, w2_ref, b2_ref, g2_ref, be2_ref,
         cw_ref, cb_ref,
         logits_ref) = refs
        labels_ref = loss_ref = None

    f32, bf16 = jnp.float32, jnp.bfloat16

    x = x_ref[...]                         # (N, HP) f32, padded hidden cols are 0
    attn_bias = bias_ref[...]              # (N, N)  f32 additive mask (0 / -1e9)

    # hoist small (1, dim) params into values once (no re-broadcast per use)
    bq, bk, bv, bo = bq_ref[...], bk_ref[...], bv_ref[...], bo_ref[...]
    b1, b2 = b1_ref[...], b2_ref[...]
    g1, be1 = g1_ref[...], be1_ref[...]
    g2, be2 = g2_ref[...], be2_ref[...]
    cb = cb_ref[...]

    def mm(a, w_ref):                      # bf16 MXU matmul, f32 accumulation
        return lax.dot_general(
            a.astype(bf16), w_ref[...],
            dimension_numbers=(((1,), (0,)), ((), ())),
            preferred_element_type=f32)

    def layernorm(y, g, b):
        # stats over the REAL hidden width only; padded cols of y are 0 and
        # gamma/beta are zero-padded so padded output cols stay 0.
        mu = jnp.sum(y, axis=-1, keepdims=True) * (1.0 / H)
        var = jnp.sum(y * y, axis=-1, keepdims=True) * (1.0 / H) - mu * mu
        return (y - mu) * lax.rsqrt(var + 1e-12) * g + b

    # ---- self-attention (single head), one flattened (N, HP) slab ----
    q = mm(x, wq_ref) + bq
    k = mm(x, wk_ref) + bk
    v = mm(x, wv_ref) + bv

    scores = lax.dot_general(              # (N, N) = q @ k^T, single MXU pass
        q.astype(bf16), k.astype(bf16),
        dimension_numbers=(((1,), (1,)), ((), ())),
        preferred_element_type=f32) * (1.0 / math.sqrt(H))
    scores = scores + attn_bias            # block-diagonal + key-padding mask (f32)

    m = jnp.max(scores, axis=-1, keepdims=True)
    e = jnp.exp(scores - m)
    p = e * pl.reciprocal(jnp.sum(e, axis=-1, keepdims=True), approx=True)

    ctx = lax.dot_general(                 # (N, HP) = p @ v
        p.astype(bf16), v.astype(bf16),
        dimension_numbers=(((1,), (0,)), ((), ())),
        preferred_element_type=f32)
    attn = mm(ctx, wo_ref) + bo

    h1 = layernorm(x + attn, g1, be1)

    # ---- feed-forward ----
    f = jax.nn.gelu(mm(h1, w1_ref) + b1, approximate=True)
    h2 = layernorm(h1 + mm(f, w2_ref) + b2, g2, be2)

    # ---- dropout = identity (eval) ; classifier (lane-dense output) ----
    logits = mm(h2, cw_ref) + cb           # (N, CP) f32, padded class cols are 0
    logits_ref[...] = logits

    if with_loss:
        # cross-entropy, ignore_index = -1, mean over valid tokens
        col = lax.broadcasted_iota(jnp.int32, (N, CP), 1)
        lm = jnp.where(col < C, logits, -1e30)          # exclude padded classes
        mx = jnp.max(lm, axis=-1, keepdims=True)
        lse = jnp.log(jnp.sum(jnp.exp(lm - mx), axis=-1, keepdims=True)) + mx

        # build the (N,1) label column from SMEM scalars (no VMEM label tensor)
        row_iota = lax.broadcasted_iota(jnp.int32, (N, 1), 0)
        lab_col = jnp.full((N, 1), -1, dtype=jnp.int32)
        for i in range(N):                               # unrolled, N = 16
            lab_col = jnp.where(row_iota == i, labels_ref[i], lab_col)

        picked = jnp.sum(jnp.where(col == lab_col, logits, 0.0),
                         axis=-1, keepdims=True)         # labels>=0 never hit pad cols
        valid = (lab_col != -1).astype(f32)
        num = jnp.sum((lse - picked) * valid, axis=(0, 1), keepdims=True)
        den = jnp.maximum(jnp.sum(valid, axis=(0, 1), keepdims=True), 1.0)
        loss_ref[...] = num * pl.reciprocal(den, approx=True)


def _forward_call(with_loss: bool):
    in_specs = [_VMEM] * 20 + ([_SMEM] if with_loss else [])
    if with_loss:
        out_shape = (jax.ShapeDtypeStruct((N, CP), jnp.float32),
                     jax.ShapeDtypeStruct((1, 1), jnp.float32))
        out_specs = (_VMEM, _VMEM)
    else:
        out_shape = jax.ShapeDtypeStruct((N, CP), jnp.float32)
        out_specs = _VMEM
    # NOTE(v7x): for production batch sizes, add a token-block grid axis with
    # dimension_semantics=("parallel",) so both TensorCores are used; at this
    # toy size a single invocation is optimal.
    return pl.pallas_call(
        partial(_fused_kernel, with_loss=with_loss),
        out_shape=out_shape,
        in_specs=in_specs,
        out_specs=out_specs,
        cost_estimate=pl.CostEstimate(flops=3_801_088,
                                      transcendentals=4_400,
                                      bytes_accessed=270_000),
    )


# ---------------------------------------------------------------------------
# Parameters (deterministic, synthetic) — zero-padded to lane-dense shapes,
# matmul weights stored in bfloat16.
# ---------------------------------------------------------------------------
def _pad2(a, r, c):
    return jnp.pad(a, ((0, r - a.shape[0]), (0, c - a.shape[1])))


def init_params(key):
    ks = jax.random.split(key, 8)
    sd = 0.02

    def rnd(k, shape):
        return jax.random.normal(k, shape, jnp.float32) * sd

    return {
        'emb':   _pad2(rnd(ks[0], (VOCAB, H)), VOCAB, HP),                   # f32
        'wq':    _pad2(rnd(ks[1], (H, H)),  HP, HP).astype(jnp.bfloat16),
        'wk':    _pad2(rnd(ks[2], (H, H)),  HP, HP).astype(jnp.bfloat16),
        'wv':    _pad2(rnd(ks[3], (H, H)),  HP, HP).astype(jnp.bfloat16),
        'wo':    _pad2(rnd(ks[4], (H, H)),  HP, HP).astype(jnp.bfloat16),
        'w1':    _pad2(rnd(ks[5], (H, FF)), HP, FP).astype(jnp.bfloat16),
        'w2':    _pad2(rnd(ks[6], (FF, H)), FP, HP).astype(jnp.bfloat16),
        'cls_w': _pad2(rnd(ks[7], (H, C)),  HP, CP).astype(jnp.bfloat16),
        'bq': jnp.zeros((1, HP), jnp.float32), 'bk': jnp.zeros((1, HP), jnp.float32),
        'bv': jnp.zeros((1, HP), jnp.float32), 'bo': jnp.zeros((1, HP), jnp.float32),
        'b1': jnp.zeros((1, FP), jnp.float32), 'b2': jnp.zeros((1, HP), jnp.float32),
        'ln1_g': _pad2(jnp.ones((1, H), jnp.float32), 1, HP),
        'ln1_b': jnp.zeros((1, HP), jnp.float32),
        'ln2_g': _pad2(jnp.ones((1, H), jnp.float32), 1, HP),
        'ln2_b': jnp.zeros((1, HP), jnp.float32),
        'cls_b': jnp.zeros((1, CP), jnp.float32),
    }


def _weight_args(p):
    return (p['wq'], p['bq'], p['wk'], p['bk'], p['wv'], p['bv'],
            p['wo'], p['bo'], p['ln1_g'], p['ln1_b'],
            p['w1'], p['b1'], p['w2'], p['b2'], p['ln2_g'], p['ln2_b'],
            p['cls_w'], p['cls_b'])


# ---------------------------------------------------------------------------
# NERModel.forward (non-banner branch)
# ---------------------------------------------------------------------------
def ner_forward(params, input_ids, attention_mask, labels=None):
    # h, *_ = self.model(input_ids, attention_mask, return_dict=False)
    ids = input_ids.reshape(-1)
    x = jnp.take(params['emb'], ids, axis=0)                    # (N, HP) glue gather
    # fold block-diagonal (per-sequence) + key-padding mask into one additive bias
    mask_flat = attention_mask.reshape(-1).astype(jnp.float32)  # (N,)
    bid = jnp.repeat(jnp.arange(B, dtype=jnp.int32), S)         # (N,) batch id per token
    allow = (bid[:, None] == bid[None, :]) & (mask_flat[None, :] > 0.5)
    attn_bias = jnp.where(allow, 0.0, -1e9).astype(jnp.float32)  # (N, N)

    args = (x, attn_bias) + _weight_args(params)
    if labels is None:
        logits_pad = _forward_call(False)(*args)
        return (logits_pad[:, :C],)                             # logits.view(-1, c)

    labels_flat = labels.reshape(-1).astype(jnp.int32)
    logits_pad, loss2d = _forward_call(True)(*(args + (labels_flat,)))
    return (loss2d[0, 0], logits_pad[:, :C])                    # (loss, logits)


if __name__ == "__main__":
    key = jax.random.PRNGKey(0)
    k_param, k_ids, k_lab = jax.random.split(key, 3)

    params = init_params(k_param)
    input_ids = jax.random.randint(k_ids, (B, S), 0, VOCAB, dtype=jnp.int32)
    attention_mask = jnp.ones((B, S), jnp.float32).at[1, 6:].set(0.0)
    labels = jax.random.randint(k_lab, (B, S), 0, C, dtype=jnp.int32).at[1, 6:].set(-1)

    fwd = jax.jit(ner_forward)

    # with labels: (loss, logits)
    loss, logits = fwd(params, input_ids, attention_mask, labels)
    # without labels: (logits,)
    (logits_only,) = fwd(params, input_ids, attention_mask)

    jax.block_until_ready((loss, logits, logits_only))
    assert logits.shape == (B * S, C) and logits_only.shape == (B * S, C)
    assert loss.shape == ()
    assert bool(jnp.isfinite(loss))
    print("KERNEL_OK")
</pallas_src>

<mosaic_0001>
module attributes {stable_mosaic.version = 11 : i64} {
  func.func @_fused_kernel(%arg0: memref<16x128xf32, #tpu.memory_space<vmem>>, %arg1: memref<16x16xf32, #tpu.memory_space<vmem>>, %arg2: memref<128x128xbf16, #tpu.memory_space<vmem>>, %arg3: memref<1x128xf32, #tpu.memory_space<vmem>>, %arg4: memref<128x128xbf16, #tpu.memory_space<vmem>>, %arg5: memref<1x128xf32, #tpu.memory_space<vmem>>, %arg6: memref<128x128xbf16, #tpu.memory_space<vmem>>, %arg7: memref<1x128xf32, #tpu.memory_space<vmem>>, %arg8: memref<128x128xbf16, #tpu.memory_space<vmem>>, %arg9: memref<1x128xf32, #tpu.memory_space<vmem>>, %arg10: memref<1x128xf32, #tpu.memory_space<vmem>>, %arg11: memref<1x128xf32, #tpu.memory_space<vmem>>, %arg12: memref<128x128xbf16, #tpu.memory_space<vmem>>, %arg13: memref<1x128xf32, #tpu.memory_space<vmem>>, %arg14: memref<128x128xbf16, #tpu.memory_space<vmem>>, %arg15: memref<1x128xf32, #tpu.memory_space<vmem>>, %arg16: memref<1x128xf32, #tpu.memory_space<vmem>>, %arg17: memref<1x128xf32, #tpu.memory_space<vmem>>, %arg18: memref<128x128xbf16, #tpu.memory_space<vmem>>, %arg19: memref<1x128xf32, #tpu.memory_space<vmem>>, %arg20: memref<16xi32, #tpu.memory_space<smem>>, %arg21: memref<16x128xf32, #tpu.memory_space<vmem>>, %arg22: memref<1x1xf32, #tpu.memory_space<vmem>>) attributes {dimension_semantics = [], scalar_prefetch = 0 : i64, scratch_operands = 0 : i64, tpu.core_type = #tpu.core_type<tc>} {
    %c0 = arith.constant 0 : index
    %c0_0 = arith.constant 0 : index
    %0 = vector.load %arg0[%c0, %c0_0] : memref<16x128xf32, #tpu.memory_space<vmem>>, vector<16x128xf32>
    %c0_1 = arith.constant 0 : index
    %c0_2 = arith.constant 0 : index
    %1 = vector.load %arg1[%c0_1, %c0_2] : memref<16x16xf32, #tpu.memory_space<vmem>>, vector<16x16xf32>
    %c0_3 = arith.constant 0 : index
    %c0_4 = arith.constant 0 : index
    %2 = vector.load %arg3[%c0_3, %c0_4] : memref<1x128xf32, #tpu.memory_space<vmem>>, vector<1x128xf32>
    %c0_5 = arith.constant 0 : index
    %c0_6 = arith.constant 0 : index
    %3 = vector.load %arg5[%c0_5, %c0_6] : memref<1x128xf32, #tpu.memory_space<vmem>>, vector<1x128xf32>
    %c0_7 = arith.constant 0 : index
    %c0_8 = arith.constant 0 : index
    %4 = vector.load %arg7[%c0_7, %c0_8] : memref<1x128xf32, #tpu.memory_space<vmem>>, vector<1x128xf32>
    %c0_9 = arith.constant 0 : index
    %c0_10 = arith.constant 0 : index
    %5 = vector.load %arg9[%c0_9, %c0_10] : memref<1x128xf32, #tpu.memory_space<vmem>>, vector<1x128xf32>
    %c0_11 = arith.constant 0 : index
    %c0_12 = arith.constant 0 : index
    %6 = vector.load %arg13[%c0_11, %c0_12] : memref<1x128xf32, #tpu.memory_space<vmem>>, vector<1x128xf32>
    %c0_13 = arith.constant 0 : index
    %c0_14 = arith.constant 0 : index
    %7 = vector.load %arg15[%c0_13, %c0_14] : memref<1x128xf32, #tpu.memory_space<vmem>>, vector<1x128xf32>
    %c0_15 = arith.constant 0 : index
    %c0_16 = arith.constant 0 : index
    %8 = vector.load %arg10[%c0_15, %c0_16] : memref<1x128xf32, #tpu.memory_space<vmem>>, vector<1x128xf32>
    %c0_17 = arith.constant 0 : index
    %c0_18 = arith.constant 0 : index
    %9 = vector.load %arg11[%c0_17, %c0_18] : memref<1x128xf32, #tpu.memory_space<vmem>>, vector<1x128xf32>
    %c0_19 = arith.constant 0 : index
    %c0_20 = arith.constant 0 : index
    %10 = vector.load %arg16[%c0_19, %c0_20] : memref<1x128xf32, #tpu.memory_space<vmem>>, vector<1x128xf32>
    %c0_21 = arith.constant 0 : index
    %c0_22 = arith.constant 0 : index
    %11 = vector.load %arg17[%c0_21, %c0_22] : memref<1x128xf32, #tpu.memory_space<vmem>>, vector<1x128xf32>
    %c0_23 = arith.constant 0 : index
    %c0_24 = arith.constant 0 : index
    %12 = vector.load %arg19[%c0_23, %c0_24] : memref<1x128xf32, #tpu.memory_space<vmem>>, vector<1x128xf32>
    %13 = arith.truncf %0 : vector<16x128xf32> to vector<16x128xbf16>
    %c0_25 = arith.constant 0 : index
    %c0_26 = arith.constant 0 : index
    %14 = vector.load %arg2[%c0_25, %c0_26] : memref<128x128xbf16, #tpu.memory_space<vmem>>, vector<128x128xbf16>
    %cst = arith.constant dense<0.000000e+00> : vector<16x128xf32>
    %15 = tpu.matmul %13, %14, %cst {dimension_numbers = #tpu.dot_dimension_numbers<[1], [0], [0], [1], [0, 0, 1, 1], [], []>} : vector<16x128xbf16>, vector<128x128xbf16>, vector<16x128xf32> -> vector<16x128xf32>
    %16 = vector.broadcast %2 : vector<1x128xf32> to vector<16x128xf32>
    %17 = arith.addf %15, %16 : vector<16x128xf32>
    %18 = arith.truncf %0 : vector<16x128xf32> to vector<16x128xbf16>
    %c0_27 = arith.constant 0 : index
    %c0_28 = arith.constant 0 : index
    %19 = vector.load %arg4[%c0_27, %c0_28] : memref<128x128xbf16, #tpu.memory_space<vmem>>, vector<128x128xbf16>
    %cst_29 = arith.constant dense<0.000000e+00> : vector<16x128xf32>
    %20 = tpu.matmul %18, %19, %cst_29 {dimension_numbers = #tpu.dot_dimension_numbers<[1], [0], [0], [1], [0, 0, 1, 1], [], []>} : vector<16x128xbf16>, vector<128x128xbf16>, vector<16x128xf32> -> vector<16x128xf32>
    %21 = vector.broadcast %3 : vector<1x128xf32> to vector<16x128xf32>
    %22 = arith.addf %20, %21 : vector<16x128xf32>
    %23 = arith.truncf %0 : vector<16x128xf32> to vector<16x128xbf16>
    %c0_30 = arith.constant 0 : index
    %c0_31 = arith.constant 0 : index
    %24 = vector.load %arg6[%c0_30, %c0_31] : memref<128x128xbf16, #tpu.memory_space<vmem>>, vector<128x128xbf16>
    %cst_32 = arith.constant dense<0.000000e+00> : vector<16x128xf32>
    %25 = tpu.matmul %23, %24, %cst_32 {dimension_numbers = #tpu.dot_dimension_numbers<[1], [0], [0], [1], [0, 0, 1, 1], [], []>} : vector<16x128xbf16>, vector<128x128xbf16>, vector<16x128xf32> -> vector<16x128xf32>
    %26 = vector.broadcast %4 : vector<1x128xf32> to vector<16x128xf32>
    %27 = arith.addf %25, %26 : vector<16x128xf32>
    %28 = arith.truncf %17 : vector<16x128xf32> to vector<16x128xbf16>
    %29 = arith.truncf %22 : vector<16x128xf32> to vector<16x128xbf16>
    %cst_33 = arith.constant dense<0.000000e+00> : vector<16x16xf32>
    %30 = tpu.matmul %28, %29, %cst_33 {dimension_numbers = #tpu.dot_dimension_numbers<[1], [1], [0], [0], [0, 0, 1, 0], [], []>} : vector<16x128xbf16>, vector<16x128xbf16>, vector<16x16xf32> -> vector<16x16xf32>
    %cst_34 = arith.constant 0.176776692 : f32
    %31 = vector.broadcast %cst_34 : f32 to vector<16x16xf32>
    %32 = arith.mulf %30, %31 : vector<16x16xf32>
    %33 = arith.addf %32, %1 : vector<16x16xf32>
    %cst_35 = arith.constant dense<0xFF800000> : vector<16xf32>
    %34 = vector.multi_reduction <maximumf>, %33, %cst_35 [1] : vector<16x16xf32> to vector<16xf32>
    %35 = vector.shape_cast %34 : vector<16xf32> to vector<16x1xf32>
    %36 = vector.broadcast %35 : vector<16x1xf32> to vector<16x16xf32>
    %37 = arith.subf %33, %36 : vector<16x16xf32>
    %38 = math.exp %37 : vector<16x16xf32>
    %cst_36 = arith.constant dense<0.000000e+00> : vector<16xf32>
    %39 = vector.multi_reduction <add>, %38, %cst_36 [1] : vector<16x16xf32> to vector<16xf32>
    %40 = vector.shape_cast %39 : vector<16xf32> to vector<16x1xf32>
    %41 = tpu.reciprocal %40 {approx = true} : vector<16x1xf32> -> vector<16x1xf32>
    %42 = vector.broadcast %41 : vector<16x1xf32> to vector<16x16xf32>
    %43 = arith.mulf %38, %42 : vector<16x16xf32>
    %44 = arith.truncf %43 : vector<16x16xf32> to vector<16x16xbf16>
    %45 = arith.truncf %27 : vector<16x128xf32> to vector<16x128xbf16>
    %cst_37 = arith.constant dense<0.000000e+00> : vector<16x128xf32>
    %46 = tpu.matmul %44, %45, %cst_37 {dimension_numbers = #tpu.dot_dimension_numbers<[1], [0], [0], [1], [0, 0, 1, 1], [], []>} : vector<16x16xbf16>, vector<16x128xbf16>, vector<16x128xf32> -> vector<16x128xf32>
    %47 = arith.truncf %46 : vector<16x128xf32> to vector<16x128xbf16>
    %c0_38 = arith.constant 0 : index
    %c0_39 = arith.constant 0 : index
    %48 = vector.load %arg8[%c0_38, %c0_39] : memref<128x128xbf16, #tpu.memory_space<vmem>>, vector<128x128xbf16>
    %cst_40 = arith.constant dense<0.000000e+00> : vector<16x128xf32>
    %49 = tpu.matmul %47, %48, %cst_40 {dimension_numbers = #tpu.dot_dimension_numbers<[1], [0], [0], [1], [0, 0, 1, 1], [], []>} : vector<16x128xbf16>, vector<128x128xbf16>, vector<16x128xf32> -> vector<16x128xf32>
    %50 = vector.broadcast %5 : vector<1x128xf32> to vector<16x128xf32>
    %51 = arith.addf %49, %50 : vector<16x128xf32>
    %52 = arith.addf %0, %51 : vector<16x128xf32>
    %cst_41 = arith.constant dense<0.000000e+00> : vector<16xf32>
    %53 = vector.multi_reduction <add>, %52, %cst_41 [1] : vector<16x128xf32> to vector<16xf32>
    %54 = vector.shape_cast %53 : vector<16xf32> to vector<16x1xf32>
    %cst_42 = arith.constant 3.125000e-02 : f32
    %55 = vector.broadcast %cst_42 : f32 to vector<16x1xf32>
    %56 = arith.mulf %54, %55 : vector<16x1xf32>
    %57 = arith.mulf %52, %52 : vector<16x128xf32>
    %cst_43 = arith.constant dense<0.000000e+00> : vector<16xf32>
    %58 = vector.multi_reduction <add>, %57, %cst_43 [1] : vector<16x128xf32> to vector<16xf32>
    %59 = vector.shape_cast %58 : vector<16xf32> to vector<16x1xf32>
    %cst_44 = arith.constant 3.125000e-02 : f32
    %60 = vector.broadcast %cst_44 : f32 to vector<16x1xf32>
    %61 = arith.mulf %59, %60 : vector<16x1xf32>
    %62 = arith.mulf %56, %56 : vector<16x1xf32>
    %63 = arith.subf %61, %62 : vector<16x1xf32>
    %64 = vector.broadcast %56 : vector<16x1xf32> to vector<16x128xf32>
    %65 = arith.subf %52, %64 : vector<16x128xf32>
    %cst_45 = arith.constant 9.99999996E-13 : f32
    %66 = vector.broadcast %cst_45 : f32 to vector<16x1xf32>
    %67 = arith.addf %63, %66 : vector<16x1xf32>
    %68 = math.rsqrt %67 : vector<16x1xf32>
    %69 = vector.broadcast %68 : vector<16x1xf32> to vector<16x128xf32>
    %70 = arith.mulf %65, %69 : vector<16x128xf32>
    %71 = vector.broadcast %8 : vector<1x128xf32> to vector<16x128xf32>
    %72 = arith.mulf %70, %71 : vector<16x128xf32>
    %73 = vector.broadcast %9 : vector<1x128xf32> to vector<16x128xf32>
    %74 = arith.addf %72, %73 : vector<16x128xf32>
    %75 = arith.truncf %74 : vector<16x128xf32> to vector<16x128xbf16>
    %c0_46 = arith.constant 0 : index
    %c0_47 = arith.constant 0 : index
    %76 = vector.load %arg12[%c0_46, %c0_47] : memref<128x128xbf16, #tpu.memory_space<vmem>>, vector<128x128xbf16>
    %cst_48 = arith.constant dense<0.000000e+00> : vector<16x128xf32>
    %77 = tpu.matmul %75, %76, %cst_48 {dimension_numbers = #tpu.dot_dimension_numbers<[1], [0], [0], [1], [0, 0, 1, 1], [], []>} : vector<16x128xbf16>, vector<128x128xbf16>, vector<16x128xf32> -> vector<16x128xf32>
    %78 = vector.broadcast %6 : vector<1x128xf32> to vector<16x128xf32>
    %79 = arith.addf %77, %78 : vector<16x128xf32>
    %80 = arith.mulf %79, %79 : vector<16x128xf32>
    %81 = arith.mulf %79, %80 : vector<16x128xf32>
    %cst_49 = arith.constant 4.471500e-02 : f32
    %82 = vector.broadcast %cst_49 : f32 to vector<16x128xf32>
    %83 = arith.mulf %82, %81 : vector<16x128xf32>
    %84 = arith.addf %79, %83 : vector<16x128xf32>
    %cst_50 = arith.constant 0.797884583 : f32
    %85 = vector.broadcast %cst_50 : f32 to vector<16x128xf32>
    %86 = arith.mulf %85, %84 : vector<16x128xf32>
    %87 = math.tanh %86 : vector<16x128xf32>
    %cst_51 = arith.constant 1.000000e+00 : f32
    %88 = vector.broadcast %cst_51 : f32 to vector<16x128xf32>
    %89 = arith.addf %88, %87 : vector<16x128xf32>
    %cst_52 = arith.constant 5.000000e-01 : f32
    %90 = vector.broadcast %cst_52 : f32 to vector<16x128xf32>
    %91 = arith.mulf %90, %89 : vector<16x128xf32>
    %92 = arith.mulf %79, %91 : vector<16x128xf32>
    %93 = arith.truncf %92 : vector<16x128xf32> to vector<16x128xbf16>
    %c0_53 = arith.constant 0 : index
    %c0_54 = arith.constant 0 : index
    %94 = vector.load %arg14[%c0_53, %c0_54] : memref<128x128xbf16, #tpu.memory_space<vmem>>, vector<128x128xbf16>
    %cst_55 = arith.constant dense<0.000000e+00> : vector<16x128xf32>
    %95 = tpu.matmul %93, %94, %cst_55 {dimension_numbers = #tpu.dot_dimension_numbers<[1], [0], [0], [1], [0, 0, 1, 1], [], []>} : vector<16x128xbf16>, vector<128x128xbf16>, vector<16x128xf32> -> vector<16x128xf32>
    %96 = arith.addf %74, %95 : vector<16x128xf32>
    %97 = vector.broadcast %7 : vector<1x128xf32> to vector<16x128xf32>
    %98 = arith.addf %96, %97 : vector<16x128xf32>
    %cst_56 = arith.constant dense<0.000000e+00> : vector<16xf32>
    %99 = vector.multi_reduction <add>, %98, %cst_56 [1] : vector<16x128xf32> to vector<16xf32>
    %100 = vector.shape_cast %99 : vector<16xf32> to vector<16x1xf32>
    %cst_57 = arith.constant 3.125000e-02 : f32
    %101 = vector.broadcast %cst_57 : f32 to vector<16x1xf32>
    %102 = arith.mulf %100, %101 : vector<16x1xf32>
    %103 = arith.mulf %98, %98 : vector<16x128xf32>
    %cst_58 = arith.constant dense<0.000000e+00> : vector<16xf32>
    %104 = vector.multi_reduction <add>, %103, %cst_58 [1] : vector<16x128xf32> to vector<16xf32>
    %105 = vector.shape_cast %104 : vector<16xf32> to vector<16x1xf32>
    %cst_59 = arith.constant 3.125000e-02 : f32
    %106 = vector.broadcast %cst_59 : f32 to vector<16x1xf32>
    %107 = arith.mulf %105, %106 : vector<16x1xf32>
    %108 = arith.mulf %102, %102 : vector<16x1xf32>
    %109 = arith.subf %107, %108 : vector<16x1xf32>
    %110 = vector.broadcast %102 : vector<16x1xf32> to vector<16x128xf32>
    %111 = arith.subf %98, %110 : vector<16x128xf32>
    %cst_60 = arith.constant 9.99999996E-13 : f32
    %112 = vector.broadcast %cst_60 : f32 to vector<16x1xf32>
    %113 = arith.addf %109, %112 : vector<16x1xf32>
    %114 = math.rsqrt %113 : vector<16x1xf32>
    %115 = vector.broadcast %114 : vector<16x1xf32> to vector<16x128xf32>
    %116 = arith.mulf %111, %115 : vector<16x128xf32>
    %117 = vector.broadcast %10 : vector<1x128xf32> to vector<16x128xf32>
    %118 = arith.mulf %116, %117 : vector<16x128xf32>
    %119 = vector.broadcast %11 : vector<1x128xf32> to vector<16x128xf32>
    %120 = arith.addf %118, %119 : vector<16x128xf32>
    %121 = arith.truncf %120 : vector<16x128xf32> to vector<16x128xbf16>
    %c0_61 = arith.constant 0 : index
    %c0_62 = arith.constant 0 : index
    %122 = vector.load %arg18[%c0_61, %c0_62] : memref<128x128xbf16, #tpu.memory_space<vmem>>, vector<128x128xbf16>
    %cst_63 = arith.constant dense<0.000000e+00> : vector<16x128xf32>
    %123 = tpu.matmul %121, %122, %cst_63 {dimension_numbers = #tpu.dot_dimension_numbers<[1], [0], [0], [1], [0, 0, 1, 1], [], []>} : vector<16x128xbf16>, vector<128x128xbf16>, vector<16x128xf32> -> vector<16x128xf32>
    %124 = vector.broadcast %12 : vector<1x128xf32> to vector<16x128xf32>
    %125 = arith.addf %123, %124 : vector<16x128xf32>
    %c0_64 = arith.constant 0 : index
    %c0_65 = arith.constant 0 : index
    %126 = vector.load %arg21[%c0_64, %c0_65] : memref<16x128xf32, #tpu.memory_space<vmem>>, vector<16x128xf32>
    tpu.vector_store %arg21[%c0_64, %c0_65], %125 {strides = array<i32>} : memref<16x128xf32, #tpu.memory_space<vmem>>, vector<16x128xf32>,
    %127 = tpu.iota {dimensions = array<i32: 1>} : vector<16x128xi32>
    %c9_i32 = arith.constant 9 : i32
    %128 = vector.broadcast %c9_i32 : i32 to vector<16x128xi32>
    %129 = arith.cmpi slt, %127, %128 : vector<16x128xi32>
    %cst_66 = arith.constant -1.000000e+30 : f32
    %130 = vector.broadcast %cst_66 : f32 to vector<16x128xf32>
    %131 = arith.select %129, %125, %130 : vector<16x128xi1>, vector<16x128xf32>
    %cst_67 = arith.constant dense<0xFF800000> : vector<16xf32>
    %132 = vector.multi_reduction <maximumf>, %131, %cst_67 [1] : vector<16x128xf32> to vector<16xf32>
    %133 = vector.shape_cast %132 : vector<16xf32> to vector<16x1xf32>
    %134 = vector.broadcast %133 : vector<16x1xf32> to vector<16x128xf32>
    %135 = arith.subf %131, %134 : vector<16x128xf32>
    %136 = math.exp %135 : vector<16x128xf32>
    %cst_68 = arith.constant dense<0.000000e+00> : vector<16xf32>
    %137 = vector.multi_reduction <add>, %136, %cst_68 [1] : vector<16x128xf32> to vector<16xf32>
    %138 = vector.shape_cast %137 : vector<16xf32> to vector<16x1xf32>
    %139 = math.log %138 : vector<16x1xf32>
    %140 = arith.addf %139, %133 : vector<16x1xf32>
    %141 = tpu.iota {dimensions = array<i32: 0>} : vector<16x1xi32>
    %c-1_i32 = arith.constant -1 : i32
    %142 = vector.broadcast %c-1_i32 : i32 to vector<16x1xi32>
    %c0_i32 = arith.constant 0 : i32
    %143 = vector.broadcast %c0_i32 : i32 to vector<16x1xi32>
    %144 = arith.cmpi eq, %141, %143 : vector<16x1xi32>
    %c0_69 = arith.constant 0 : index
    %145 = memref.load %arg20[%c0_69] : memref<16xi32, #tpu.memory_space<smem>>
    %146 = vector.broadcast %145 : i32 to vector<16x1xi32>
    %147 = arith.select %144, %146, %142 : vector<16x1xi1>, vector<16x1xi32>
    %c1_i32 = arith.constant 1 : i32
    %148 = vector.broadcast %c1_i32 : i32 to vector<16x1xi32>
    %149 = arith.cmpi eq, %141, %148 : vector<16x1xi32>
    %c1 = arith.constant 1 : index
    %150 = memref.load %arg20[%c1] : memref<16xi32, #tpu.memory_space<smem>>
    %151 = vector.broadcast %150 : i32 to vector<16x1xi32>
    %152 = arith.select %149, %151, %147 : vector<16x1xi1>, vector<16x1xi32>
    %c2_i32 = arith.constant 2 : i32
    %153 = vector.broadcast %c2_i32 : i32 to vector<16x1xi32>
    %154 = arith.cmpi eq, %141, %153 : vector<16x1xi32>
    %c2 = arith.constant 2 : index
    %155 = memref.load %arg20[%c2] : memref<16xi32, #tpu.memory_space<smem>>
    %156 = vector.broadcast %155 : i32 to vector<16x1xi32>
    %157 = arith.select %154, %156, %152 : vector<16x1xi1>, vector<16x1xi32>
    %c3_i32 = arith.constant 3 : i32
    %158 = vector.broadcast %c3_i32 : i32 to vector<16x1xi32>
    %159 = arith.cmpi eq, %141, %158 : vector<16x1xi32>
    %c3 = arith.constant 3 : index
    %160 = memref.load %arg20[%c3] : memref<16xi32, #tpu.memory_space<smem>>
    %161 = vector.broadcast %160 : i32 to vector<16x1xi32>
    %162 = arith.select %159, %161, %157 : vector<16x1xi1>, vector<16x1xi32>
    %c4_i32 = arith.constant 4 : i32
    %163 = vector.broadcast %c4_i32 : i32 to vector<16x1xi32>
    %164 = arith.cmpi eq, %141, %163 : vector<16x1xi32>
    %c4 = arith.constant 4 : index
    %165 = memref.load %arg20[%c4] : memref<16xi32, #tpu.memory_space<smem>>
    %166 = vector.broadcast %165 : i32 to vector<16x1xi32>
    %167 = arith.select %164, %166, %162 : vector<16x1xi1>, vector<16x1xi32>
    %c5_i32 = arith.constant 5 : i32
    %168 = vector.broadcast %c5_i32 : i32 to vector<16x1xi32>
    %169 = arith.cmpi eq, %141, %168 : vector<16x1xi32>
    %c5 = arith.constant 5 : index
    %170 = memref.load %arg20[%c5] : memref<16xi32, #tpu.memory_space<smem>>
    %171 = vector.broadcast %170 : i32 to vector<16x1xi32>
    %172 = arith.select %169, %171, %167 : vector<16x1xi1>, vector<16x1xi32>
    %c6_i32 = arith.constant 6 : i32
    %173 = vector.broadcast %c6_i32 : i32 to vector<16x1xi32>
    %174 = arith.cmpi eq, %141, %173 : vector<16x1xi32>
    %c6 = arith.constant 6 : index
    %175 = memref.load %arg20[%c6] : memref<16xi32, #tpu.memory_space<smem>>
    %176 = vector.broadcast %175 : i32 to vector<16x1xi32>
    %177 = arith.select %174, %176, %172 : vector<16x1xi1>, vector<16x1xi32>
    %c7_i32 = arith.constant 7 : i32
    %178 = vector.broadcast %c7_i32 : i32 to vector<16x1xi32>
    %179 = arith.cmpi eq, %141, %178 : vector<16x1xi32>
    %c7 = arith.constant 7 : index
    %180 = memref.load %arg20[%c7] : memref<16xi32, #tpu.memory_space<smem>>
    %181 = vector.broadcast %180 : i32 to vector<16x1xi32>
    %182 = arith.select %179, %181, %177 : vector<16x1xi1>, vector<16x1xi32>
    %c8_i32 = arith.constant 8 : i32
    %183 = vector.broadcast %c8_i32 : i32 to vector<16x1xi32>
    %184 = arith.cmpi eq, %141, %183 : vector<16x1xi32>
    %c8 = arith.constant 8 : index
    %185 = memref.load %arg20[%c8] : memref<16xi32, #tpu.memory_space<smem>>
    %186 = vector.broadcast %185 : i32 to vector<16x1xi32>
    %187 = arith.select %184, %186, %182 : vector<16x1xi1>, vector<16x1xi32>
    %c9_i32_70 = arith.constant 9 : i32
    %188 = vector.broadcast %c9_i32_70 : i32 to vector<16x1xi32>
    %189 = arith.cmpi eq, %141, %188 : vector<16x1xi32>
    %c9 = arith.constant 9 : index
    %190 = memref.load %arg20[%c9] : memref<16xi32, #tpu.memory_space<smem>>
    %191 = vector.broadcast %190 : i32 to vector<16x1xi32>
    %192 = arith.select %189, %191, %187 : vector<16x1xi1>, vector<16x1xi32>
    %c10_i32 = arith.constant 10 : i32
    %193 = vector.broadcast %c10_i32 : i32 to vector<16x1xi32>
    %194 = arith.cmpi eq, %141, %193 : vector<16x1xi32>
    %c10 = arith.constant 10 : index
    %195 = memref.load %arg20[%c10] : memref<16xi32, #tpu.memory_space<smem>>
    %196 = vector.broadcast %195 : i32 to vector<16x1xi32>
    %197 = arith.select %194, %196, %192 : vector<16x1xi1>, vector<16x1xi32>
    %c11_i32 = arith.constant 11 : i32
    %198 = vector.broadcast %c11_i32 : i32 to vector<16x1xi32>
    %199 = arith.cmpi eq, %141, %198 : vector<16x1xi32>
    %c11 = arith.constant 11 : index
    %200 = memref.load %arg20[%c11] : memref<16xi32, #tpu.memory_space<smem>>
    %201 = vector.broadcast %200 : i32 to vector<16x1xi32>
    %202 = arith.select %199, %201, %197 : vector<16x1xi1>, vector<16x1xi32>
    %c12_i32 = arith.constant 12 : i32
    %203 = vector.broadcast %c12_i32 : i32 to vector<16x1xi32>
    %204 = arith.cmpi eq, %141, %203 : vector<16x1xi32>
    %c12 = arith.constant 12 : index
    %205 = memref.load %arg20[%c12] : memref<16xi32, #tpu.memory_space<smem>>
    %206 = vector.broadcast %205 : i32 to vector<16x1xi32>
    %207 = arith.select %204, %206, %202 : vector<16x1xi1>, vector<16x1xi32>
    %c13_i32 = arith.constant 13 : i32
    %208 = vector.broadcast %c13_i32 : i32 to vector<16x1xi32>
    %209 = arith.cmpi eq, %141, %208 : vector<16x1xi32>
    %c13 = arith.constant 13 : index
    %210 = memref.load %arg20[%c13] : memref<16xi32, #tpu.memory_space<smem>>
    %211 = vector.broadcast %210 : i32 to vector<16x1xi32>
    %212 = arith.select %209, %211, %207 : vector<16x1xi1>, vector<16x1xi32>
    %c14_i32 = arith.constant 14 : i32
    %213 = vector.broadcast %c14_i32 : i32 to vector<16x1xi32>
    %214 = arith.cmpi eq, %141, %213 : vector<16x1xi32>
    %c14 = arith.constant 14 : index
    %215 = memref.load %arg20[%c14] : memref<16xi32, #tpu.memory_space<smem>>
    %216 = vector.broadcast %215 : i32 to vector<16x1xi32>
    %217 = arith.select %214, %216, %212 : vector<16x1xi1>, vector<16x1xi32>
    %c15_i32 = arith.constant 15 : i32
    %218 = vector.broadcast %c15_i32 : i32 to vector<16x1xi32>
    %219 = arith.cmpi eq, %141, %218 : vector<16x1xi32>
    %c15 = arith.constant 15 : index
    %220 = memref.load %arg20[%c15] : memref<16xi32, #tpu.memory_space<smem>>
    %221 = vector.broadcast %220 : i32 to vector<16x1xi32>
    %222 = arith.select %219, %221, %217 : vector<16x1xi1>, vector<16x1xi32>
    %223 = vector.broadcast %222 : vector<16x1xi32> to vector<16x128xi32>
    %224 = arith.cmpi eq, %127, %223 : vector<16x128xi32>
    %cst_71 = arith.constant 0.000000e+00 : f32
    %225 = vector.broadcast %cst_71 : f32 to vector<16x128xf32>
    %226 = arith.select %224, %125, %225 : vector<16x128xi1>, vector<16x128xf32>
    %cst_72 = arith.constant dense<0.000000e+00> : vector<16xf32>
    %227 = vector.multi_reduction <add>, %226, %cst_72 [1] : vector<16x128xf32> to vector<16xf32>
    %228 = vector.shape_cast %227 : vector<16xf32> to vector<16x1xf32>
    %c-1_i32_73 = arith.constant -1 : i32
    %229 = vector.broadcast %c-1_i32_73 : i32 to vector<16x1xi32>
    %230 = arith.cmpi ne, %222, %229 : vector<16x1xi32>
    %231 = arith.extui %230 : vector<16x1xi1> to vector<16x1xi32>
    %232 = arith.sitofp %231 : vector<16x1xi32> to vector<16x1xf32>
    %233 = arith.subf %140, %228 : vector<16x1xf32>
    %234 = arith.mulf %233, %232 : vector<16x1xf32>
    %235 = vector.shape_cast %234 : vector<16x1xf32> to vector<1x16x1xf32>
    %cst_74 = arith.constant dense<0.000000e+00> : vector<1xf32>
    %236 = vector.multi_reduction <add>, %235, %cst_74 [1, 2] : vector<1x16x1xf32> to vector<1xf32>
    %237 = vector.shape_cast %236 : vector<1xf32> to vector<1x1x1xf32>
    %238 = vector.extract %237[0, 0, 0] : f32 from vector<1x1x1xf32>
    %239 = vector.broadcast %238 : f32 to vector<1x1xf32>
    %240 = vector.shape_cast %232 : vector<16x1xf32> to vector<1x16x1xf32>
    %cst_75 = arith.constant dense<0.000000e+00> : vector<1xf32>
    %241 = vector.multi_reduction <add>, %240, %cst_75 [1, 2] : vector<1x16x1xf32> to vector<1xf32>
    %242 = vector.shape_cast %241 : vector<1xf32> to vector<1x1x1xf32>
    %243 = vector.extract %242[0, 0, 0] : f32 from vector<1x1x1xf32>
    %244 = vector.broadcast %243 : f32 to vector<1x1xf32>
    %cst_76 = arith.constant 1.000000e+00 : f32
    %245 = vector.broadcast %cst_76 : f32 to vector<1x1xf32>
    %246 = arith.maximumf %244, %245 : vector<1x1xf32>
    %247 = tpu.reciprocal %246 {approx = true} : vector<1x1xf32> -> vector<1x1xf32>
    %248 = arith.mulf %239, %247 : vector<1x1xf32>
    %c0_77 = arith.constant 0 : index
    %c0_78 = arith.constant 0 : index
    %249 = vector.load %arg22[%c0_77, %c0_78] : memref<1x1xf32, #tpu.memory_space<vmem>>, vector<1x1xf32>
    tpu.vector_store %arg22[%c0_77, %c0_78], %248 {strides = array<i32>} : memref<1x1xf32, #tpu.memory_space<vmem>>, vector<1x1xf32>,
    return
  }
}

</mosaic_0001>

<bundles_post_ra>
// kernel: ner_forward.1
= control target key start
LH: loop header
LB: loop body
LE: loop exit
PB: predicated region body
PF: predicated region fallthrough
CT: control target
= control target key end

     0   :  { %s2593_s0 = inlined_call_operand.vmem [shape: f32[16,128], index: 0, kind: input, shape index: {}]   ;;  %s2594_s1 = inlined_call_operand.vmem [shape: f32[16,16], index: 1, kind: input, shape index: {}]   ;;  %s2595_s2 = inlined_call_operand.vmem [shape: bf16[128,128], index: 2, kind: input, shape index: {}]   ;;  %s2596_s3 = inlined_call_operand.vmem [shape: f32[1,128], index: 3, kind: input, shape index: {}]   ;;  %s2597_s4 = inlined_call_operand.vmem [shape: bf16[128,128], index: 4, kind: input, shape index: {}]   ;;  %s2598_s5 = inlined_call_operand.vmem [shape: f32[1,128], index: 5, kind: input, shape index: {}]   ;;  %s2599_s6 = inlined_call_operand.vmem [shape: bf16[128,128], index: 6, kind: input, shape index: {}]   ;;  %s2600_s7 = inlined_call_operand.hbm [shape: f32[1,128], index: 7, kind: input, shape index: {}]   ;;  %s2601_s8 = inlined_call_operand.vmem [shape: bf16[128,128], index: 8, kind: input, shape index: {}]   ;;  %s2602_s9 = inlined_call_operand.hbm [shape: f32[1,128], index: 9, kind: input, shape index: {}]   ;;  %s2603_s10 = inlined_call_operand.vmem [shape: f32[1,128], index: 10, kind: input, shape index: {}]   ;;  %s2604_s11 = inlined_call_operand.vmem [shape: f32[1,128], index: 11, kind: input, shape index: {}]   ;;  %s2605_s12 = inlined_call_operand.hbm [shape: bf16[128,128], index: 12, kind: input, shape index: {}]   ;;  %s2606_s13 = inlined_call_operand.hbm [shape: f32[1,128], index: 13, kind: input, shape index: {}]   ;;  %s2607_s14 = inlined_call_operand.hbm [shape: bf16[128,128], index: 14, kind: input, shape index: {}]   ;;  %s2608_s15 = inlined_call_operand.hbm [shape: f32[1,128], index: 15, kind: input, shape index: {}]   ;;  %s2609_s16 = inlined_call_operand.vmem [shape: f32[1,128], index: 16, kind: input, shape index: {}]   ;;  %s2610_s17 = inlined_call_operand.vmem [shape: f32[1,128], index: 17, kind: input, shape index: {}]   ;;  %s2611_s18 = inlined_call_operand.hbm [shape: bf16[128,128], index: 18, kind: input, shape index: {}]   ;;  %s2612_s19 = inlined_call_operand.hbm [shape: f32[1,128], index: 19, kind: input, shape index: {}]   ;;  %s2613_s20 = inlined_call_operand.vmem [shape: s32[16], index: 20, kind: input, shape index: {}]   ;;  %s2614_s21 = inlined_call_operand.hbm [shape: f32[16,128], index: 21, kind: output, shape index: {0}]   ;;  %s2615_s22 = inlined_call_operand.hbm [shape: f32[1,1], index: 22, kind: output, shape index: {1}]  }
   0x1   :  { %2621 = sst [smem:[#allocation29_spill]] %s2593_s0 }
   0x2   :  { %2622 = sst [smem:[#allocation30_spill]] %s2594_s1 }
   0x3   :  { %2623 = sst [smem:[#allocation31_spill]] %s2595_s2 }
   0x4   :  { %2624 = sst [smem:[#allocation32_spill]] %s2596_s3 }
   0x5   :  { %2625 = sst [smem:[#allocation33_spill]] %s2597_s4 }
   0x6   :  { %2626 = sst [smem:[#allocation34_spill]] %s2598_s5 }
   0x7   :  { %2627 = sst [smem:[#allocation35_spill]] %s2599_s6 }
   0x8   :  { %28 = vsyncpa [#allocation3], 0 }
   0x9   :  { %29 = vsyncpa [#allocation7], 0 }
   0xa   :  { %30 = vsyncpa [#allocation10], 0 }
   0xb   :  { %31 = vsyncpa [#allocation13], 0 }
   0xc   :  { %32 = vsyncpa [#allocation16], 0 }
   0xd   :  { %33 = vsyncpa [#allocation5], 0 }
   0xe   :  { %34 = vsyncpa [#allocation4], 0 }
   0xf   :  { %35 = vsyncpa [#allocation20], 0  ;;  %s2077_s3 = smov [#allocation6]   ;;  %s2078_s29 = smov [#allocation9]  }
  0x10   :  { %s68_s28 = sshll.u32 %s2077_s3, 4  ;;  %s94_s30 = sshll.u32 %s2078_s29, 4  ;;  %s69_s28 = int_to_ptr.vmem [resolvable:$true] %s68_s28  ;;  %s95_s30 = int_to_ptr.vmem [resolvable:$true] %s94_s30 }
  0x11   :  { %s1829_s23 = scalar_lea.hbm %s2602_s9, 16 }
  0x12   :  { %p1830_p0 = scmp.ne.s32.totalorder %s2602_s9, %s1829_s23  ;;  %p1833_p1 = scmp.lt.u32.totalorder %s1829_s23, %s2602_s9 }
  0x14   :  { %p1835_p2 = pnand %p1833_p1, %p1830_p0 }
  0x16   :  { %1838 = shalt.err (!%p1835_p2)
}
  0x17   :  { %s1839_s25 = scalar_lea.vmem %s69_s28, 16  ;;  %s1843_s26 = scalar_lea.vmem %s69_s28, 32 }
  0x18   :  { %p1840_p3 = scmp.ne.s32.totalorder %s69_s28, %s1839_s25  ;;  %p1844_p4 = scmp.lt.s32.totalorder %s69_s28, %s69_s28 }
  0x19   :  { %p1845_p5 = scmp.lt.s32.totalorder %s1843_s26, %s1839_s25 }
  0x1b   :  { %p1846_p6 = por %p1845_p5, %p1844_p4 }
  0x1d   :  { %p1847_p7 = pnand %p1846_p6, %p1840_p3 }
  0x1f   :  { %1850 = shalt.err (!%p1847_p7)
}
  0x20   :  { %71 = dma.hbm_to_vmem [thread:$0]  %s2602_s9, 16, %s69_s28, [#allocation7]  }
  0x21   :  { %s1851_s4 = scalar_lea.hbm %s2606_s13, 16 }
  0x22   :  { %p1852_p8 = scmp.ne.s32.totalorder %s2606_s13, %s1851_s4  ;;  %p1855_p9 = scmp.lt.u32.totalorder %s1851_s4, %s2606_s13 }
  0x24   :  { %p1857_p10 = pnand %p1855_p9, %p1852_p8 }
  0x26   :  { %1860 = shalt.err (!%p1857_p10)
}
  0x27   :  { %s1861_s24 = scalar_lea.vmem %s95_s30, 16  ;;  %s1865_s6 = scalar_lea.vmem %s95_s30, 32 }
  0x28   :  { %p1862_p11 = scmp.ne.s32.totalorder %s95_s30, %s1861_s24  ;;  %p1866_p12 = scmp.lt.s32.totalorder %s95_s30, %s95_s30 }
  0x29   :  { %p1867_p13 = scmp.lt.s32.totalorder %s1865_s6, %s1861_s24 }
  0x2b   :  { %p1868_p0 = por %p1867_p13, %p1866_p12 }
  0x2d   :  { %p1869_p1 = pnand %p1868_p0, %p1862_p11 }
  0x2f   :  { %1872 = shalt.err (!%p1869_p1)
}
  0x30   :  { %97 = dma.hbm_to_vmem [thread:$0]  %s2606_s13, 16, %s95_s30, [#allocation10]  }
  0x31   :  { %s2079_s25 = smov [#allocation12]   ;;  %s2080_s2 = smov [#allocation2]  }
  0x32   :  { %s116_s26 = sshll.u32 %s2079_s25, 4  ;;  %s56_s27 = sshll.u32 %s2080_s2, 4  ;;  %s117_s26 = int_to_ptr.vmem [resolvable:$true] %s116_s26  ;;  %s57_s27 = int_to_ptr.vmem [resolvable:$true] %s56_s27 }
  0x33   :  { %s1873_s4 = scalar_lea.hbm %s2608_s15, 16 }
  0x34   :  { %p1874_p2 = scmp.ne.s32.totalorder %s2608_s15, %s1873_s4  ;;  %p1877_p3 = scmp.lt.u32.totalorder %s1873_s4, %s2608_s15 }
  0x36   :  { %p1879_p4 = pnand %p1877_p3, %p1874_p2 }
  0x38   :  { %1882 = shalt.err (!%p1879_p4)
}
  0x39   :  { %s1883_s13 = scalar_lea.vmem %s117_s26, 16  ;;  %s1887_s30 = scalar_lea.vmem %s117_s26, 32 }
  0x3a   :  { %p1884_p5 = scmp.ne.s32.totalorder %s117_s26, %s1883_s13  ;;  %p1888_p6 = scmp.lt.s32.totalorder %s117_s26, %s117_s26 }
  0x3b   :  { %p1889_p7 = scmp.lt.s32.totalorder %s1887_s30, %s1883_s13 }
  0x3d   :  { %p1890_p8 = por %p1889_p7, %p1888_p6 }
  0x3f   :  { %p1891_p9 = pnand %p1890_p8, %p1884_p5 }
  0x41   :  { %1894 = shalt.err (!%p1891_p9)
}
  0x42   :  { %119 = dma.hbm_to_vmem [thread:$0]  %s2608_s15, 16, %s117_s26, [#allocation13]  }
  0x43   :  { %s1895_s25 = scalar_lea.hbm %s2600_s7, 16 }
  0x44   :  { %p1896_p10 = scmp.ne.s32.totalorder %s2600_s7, %s1895_s25  ;;  %p1899_p11 = scmp.lt.u32.totalorder %s1895_s25, %s2600_s7 }
  0x46   :  { %p1901_p12 = pnand %p1899_p11, %p1896_p10 }
  0x48   :  { %1904 = shalt.err (!%p1901_p12)
}
  0x49   :  { %s1905_s0 = scalar_lea.vmem %s57_s27, 16  ;;  %s1909_s23 = scalar_lea.vmem %s57_s27, 32 }
  0x4a   :  { %p1906_p13 = scmp.ne.s32.totalorder %s57_s27, %s1905_s0  ;;  %p1910_p0 = scmp.lt.s32.totalorder %s57_s27, %s57_s27 }
  0x4b   :  { %p1911_p1 = scmp.lt.s32.totalorder %s1909_s23, %s1905_s0 }
  0x4d   :  { %p1912_p2 = por %p1911_p1, %p1910_p0 }
  0x4f   :  { %p1913_p3 = pnand %p1912_p2, %p1906_p13 }
  0x51   :  { %1916 = shalt.err (!%p1913_p3)
}
  0x52   :  { %59 = dma.hbm_to_vmem [thread:$0]  %s2600_s7, 16, %s57_s27, [#allocation3]  }
  0x53   :  { %s2081_s1 = smov [#allocation8]   ;;  %s1917_s24 = scalar_lea.hbm %s2605_s12, 1024 }
  0x54   :  { %s81_s5 = sshll.u32 %s2081_s1, 4  ;;  %p1918_p4 = scmp.ne.s32.totalorder %s2605_s12, %s1917_s24  ;;  %s82_s5 = int_to_ptr.vmem [resolvable:$true] %s81_s5 }
  0x55   :  { %p1921_p5 = scmp.lt.u32.totalorder %s1917_s24, %s2605_s12 }
  0x57   :  { %p1923_p6 = pnand %p1921_p5, %p1918_p4 }
  0x59   :  { %1926 = shalt.err (!%p1923_p6)
}
  0x5a   :  { %s1927_s2 = scalar_lea.vmem %s82_s5, 1024  ;;  %p1932_p8 = scmp.lt.s32.totalorder %s82_s5, %s82_s5 }
  0x5b   :  { %p1928_p7 = scmp.ne.s32.totalorder %s82_s5, %s1927_s2  ;;  %p1933_p9 = scmp.lt.s32.totalorder %s1927_s2, %s1927_s2 }
  0x5d   :  { %p1934_p10 = por %p1933_p9, %p1932_p8 }
  0x5f   :  { %p1935_p11 = pnand %p1934_p10, %p1928_p7 }
  0x61   :  { %1938 = shalt.err (!%p1935_p11)
}
  0x62   :  { %s2082_s7 = smov 64   ;;  %s2083_s27 = smov 4  }
  0x63   :  { %87 = dma.hbm_to_vmem [thread:$0]  %s2605_s12, 1024, %s82_s5, [#allocation7], %s2082_s7, %s2082_s7, %s2083_s27  }
  0x64   :  { %s2084_s4 = smov [#allocation11]   ;;  %s2085_s23 = smov [#allocation14]  }
  0x65   :  { %s103_s0 = sshll.u32 %s2084_s4, 4  ;;  %s129_s15 = sshll.u32 %s2085_s23, 4  ;;  %s104_s0 = int_to_ptr.vmem [resolvable:$true] %s103_s0  ;;  %s130_s15 = int_to_ptr.vmem [resolvable:$true] %s129_s15 }
  0x66   :  { %s1939_s13 = scalar_lea.hbm %s2607_s14, 1024 }
  0x67   :  { %p1940_p12 = scmp.ne.s32.totalorder %s2607_s14, %s1939_s13  ;;  %p1943_p13 = scmp.lt.u32.totalorder %s1939_s13, %s2607_s14 }
  0x69   :  { %p1945_p0 = pnand %p1943_p13, %p1940_p12 }
  0x6b   :  { %1948 = shalt.err (!%p1945_p0)
}
  0x6c   :  { %s1949_s12 = scalar_lea.vmem %s104_s0, 1024  ;;  %p1954_p2 = scmp.lt.s32.totalorder %s104_s0, %s104_s0 }
  0x6d   :  { %p1950_p1 = scmp.ne.s32.totalorder %s104_s0, %s1949_s12  ;;  %p1955_p3 = scmp.lt.s32.totalorder %s1949_s12, %s1949_s12 }
  0x6f   :  { %p1956_p4 = por %p1955_p3, %p1954_p2 }
  0x71   :  { %p1957_p5 = pnand %p1956_p4, %p1950_p1 }
  0x73   :  { %1960 = shalt.err (!%p1957_p5)
}
  0x74   :  { %109 = dma.hbm_to_vmem [thread:$0]  %s2607_s14, 1024, %s104_s0, [#allocation10], %s2082_s7, %s2082_s7, %s2083_s27  }
  0x75   :  { %s1961_s3 = scalar_lea.hbm %s2611_s18, 1024 }
  0x76   :  { %p1962_p6 = scmp.ne.s32.totalorder %s2611_s18, %s1961_s3  ;;  %p1965_p7 = scmp.lt.u32.totalorder %s1961_s3, %s2611_s18 }
  0x78   :  { %p1967_p8 = pnand %p1965_p7, %p1962_p6 }
  0x7a   :  { %1970 = shalt.err (!%p1967_p8)
}
  0x7b   :  { %s1971_s1 = scalar_lea.vmem %s130_s15, 1024  ;;  %p1976_p10 = scmp.lt.s32.totalorder %s130_s15, %s130_s15 }
  0x7c   :  { %p1972_p9 = scmp.ne.s32.totalorder %s130_s15, %s1971_s1  ;;  %p1977_p11 = scmp.lt.s32.totalorder %s1971_s1, %s1971_s1 }
  0x7e   :  { %p1978_p12 = por %p1977_p11, %p1976_p10 }
  0x80   :  { %p1979_p13 = pnand %p1978_p12, %p1972_p9 }
  0x82   :  { %1982 = shalt.err (!%p1979_p13)
}
  0x83   :  { %135 = dma.hbm_to_vmem [thread:$0]  %s2611_s18, 1024, %s130_s15, [#allocation13], %s2082_s7, %s2082_s7, %s2083_s27  }
  0x84   :  { %s2086_s13 = smov [#allocation15]   ;;  %s152_s9 = sshll.u32 %s2613_s20, 4  ;;  %s153_s9 = int_to_ptr.vmem [resolvable:$true] %s152_s9 }
  0x85   :  { %s142_s30 = sshll.u32 %s2086_s13, 4  ;;  %s1983_s28 = scalar_lea.hbm %s2612_s19, 16  ;;  %s143_s30 = int_to_ptr.vmem [resolvable:$true] %s142_s30 }
  0x86   :  { %p1984_p0 = scmp.ne.s32.totalorder %s2612_s19, %s1983_s28  ;;  %p1987_p1 = scmp.lt.u32.totalorder %s1983_s28, %s2612_s19 }
  0x88   :  { %p1989_p2 = pnand %p1987_p1, %p1984_p0 }
  0x8a   :  { %1992 = shalt.err (!%p1989_p2)
}
  0x8b   :  { %s1993_s18 = scalar_lea.vmem %s143_s30, 16  ;;  %s1997_s7 = scalar_lea.vmem %s143_s30, 32 }
  0x8c   :  { %p1994_p3 = scmp.ne.s32.totalorder %s143_s30, %s1993_s18  ;;  %p1998_p4 = scmp.lt.s32.totalorder %s143_s30, %s143_s30 }
  0x8d   :  { %p1999_p5 = scmp.lt.s32.totalorder %s1997_s7, %s1993_s18 }
  0x8f   :  { %p2000_p6 = por %p1999_p5, %p1998_p4 }
  0x91   :  { %p2001_p7 = pnand %p2000_p6, %p1994_p3 }
  0x93   :  { %2004 = shalt.err (!%p2001_p7)
}
  0x94   :  { %145 = dma.hbm_to_vmem [thread:$0]  %s2612_s19, 16, %s143_s30, [#allocation16]  }
  0x95   :  { %s2005_s15 = scalar_lea.vmem %s153_s9, 16  ;;  %p2010_p9 = scmp.lt.s32.totalorder %s153_s9, %s153_s9 }
  0x96   :  { %p2006_p8 = scmp.ne.s32.totalorder %s153_s9, %s2005_s15  ;;  %p2011_p10 = scmp.lt.s32.totalorder %s2005_s15, %s2005_s15 }
  0x98   :  { %p2012_p11 = por %p2011_p10, %p2010_p9 }
  0x9a   :  { %p2013_p12 = pnand %p2012_p11, %p2006_p8 }
  0x9c   :  { %2016 = shalt.err (!%p2013_p12)
}
  0x9d   :  { %s2087_s4 = smov [#allocation17]  }
  0x9e   :  { %155 = dma.vmem_to_smem %s153_s9, 16, %s2087_s4, [#allocation5]  }
  0x9f   :  { %2061 = dma.done.wait [#allocation3], 16  }
  0xa0   :  { %2062 = vsyncadd [#allocation3], 4294967280 }
  0xa1   :  { %2063 = dma.done.wait [#allocation7], 1040  }
  0xa2   :  { %2064 = vsyncadd [#allocation7], 4294966256 }
  0xa3   :  { %2065 = dma.done.wait [#allocation10], 1040  }
  0xa4   :  { %2066 = vsyncadd [#allocation10], 4294966256 }
  0xa5   :  { %2067 = dma.done.wait [#allocation13], 1040  }
  0xa6   :  { %2068 = vsyncadd [#allocation13], 4294966256 }
  0xa7   :  { %2069 = dma.done.wait [#allocation16], 16  }
  0xa8   :  { %2070 = vsyncadd [#allocation16], 4294967280 }
  0xa9   :  { %2071 = dma.done.wait [#allocation5], 16  }
  0xaa   :  { %2072 = vsyncadd [#allocation5], 4294967280 }
  0xab   :  { %183 = sfence }
  0xac   :  { %s2628_s26 = sld [smem:[#allocation33_spill]]  ;;  %v2088_v1 = vmov 0.0   ;;  %s2629_s30 = sld [smem:[#allocation31_spill]]  ;;  %vm2089_vm0 = vmmov 0   ;;  %vm581_vm1 = vcmask 130048  }
  0xad   :  { %1590 = vmatprep.subr.bf16.mxu1 %v2088_v1  ;;  %1570 = vmatprep.subr.bf16.mxu0 %v2088_v1  ;;  %s2630_s5 = sld [smem:[#allocation29_spill]]  ;;  %s2631_s29 = sld [smem:[#allocation34_spill]] }
  0xae   :  { %1606 = vmatprep.mubr.msk.bf16.mxu1 %vm2089_vm0, %v2088_v1  ;;  %1586 = vmatprep.mubr.msk.bf16.mxu0 %vm2089_vm0, %v2088_v1  ;;  %s2632_s20 = sld [smem:[#allocation32_spill]]  ;;  %s2633_s4 = sld [smem:[#allocation35_spill]] }
  0xaf   :  { %s1487_s18 = sld [smem:[#allocation17 + $0x2]]  ;;  %s2532_s7 = sld [smem:[#allocation17 + $0x8]] }
  0xb0   :  { %s2534_s27 = sld [smem:[#allocation17 + $0x9]]  ;;  %s2536_s15 = sld [smem:[#allocation17 + $0x5]] }
  0xb1   :  { %s1492_s19 = sld [smem:[#allocation17 + $0x7]]  ;;  %s2542_s23 = sld [smem:[#allocation17 + $0xb]] }
  0xb2   :  { %v1743_v0 = vld [vmem:[%s2628_s26] sm:$0xff]   ;;  %v1744_v2 = vld [vmem:[%s2628_s26 + $0x8] sm:$0xff]   ;;  %v1746_v5 = vld [vmem:[%s2628_s26 + $0x10] sm:$0xff]   ;;  %s2544_s1 = sld [smem:[#allocation17 + $0xc]]  ;;  %s2547_s14 = sld [smem:[#allocation17 + $0xd]] }
  0xb3   :  { %1591 = vmatpush3.bf16.msra.mxu1 %v1743_v0  ;;  %v1745_v3 = vld [vmem:[%s2629_s30] sm:$0xff]   ;;  %v1747_v4 = vld [vmem:[%s2629_s30 + $0x8] sm:$0xff]   ;;  %v1749_v6 = vld [vmem:[%s2629_s30 + $0x10] sm:$0xff]   ;;  %s2549_s0 = sld [smem:[#allocation17 + $0xe]]  ;;  %s2551_s13 = sld [smem:[#allocation17 + $0xf]] }
  0xb4   :  { %1592 = vmatprep.subr.bf16.mxu1 %v2088_v1  ;;  %1571 = vmatpush3.bf16.msra.mxu0 %v1745_v3  ;;  %v1748_v7 = vld [vmem:[%s2628_s26 + $0x18] sm:$0xff]   ;;  %v1750_v9 = vld [vmem:[%s2628_s26 + $0x20] sm:$0xff]   ;;  %v1752_v10 = vld [vmem:[%s2628_s26 + $0x28] sm:$0xff]   ;;  %s2090_s24 = smov [#allocation18]  }
  0xb5   :  { %1572 = vmatprep.subr.bf16.mxu0 %v2088_v1  ;;  %v1751_v8 = vld [vmem:[%s2629_s30 + $0x18] sm:$0xff]   ;;  %v1753_v11 = vld [vmem:[%s2629_s30 + $0x20] sm:$0xff]   ;;  %v1755_v12 = vld [vmem:[%s2629_s30 + $0x28] sm:$0xff]   ;;  %s1387_s6 = sshll.u32 %s2090_s24, 4  ;;  %s1388_s6 = int_to_ptr.vmem [resolvable:$true] %s1387_s6 }
  0xb6   :  { %v1754_v13 = vld [vmem:[%s2628_s26 + $0x30] sm:$0xff]   ;;  %v1756_v15 = vld [vmem:[%s2628_s26 + $0x38] sm:$0xff]   ;;  %v2382_v16 = vld [vmem:[%s2630_s5] sm:$0xff]  ;;  %s2017_s9 = scalar_lea.vmem %s1388_s6, 256  ;;  %p2022_p0 = scmp.lt.s32.totalorder %s1388_s6, %s1388_s6 }
  0xb7   :  { %1593 = vmatpush3.bf16.msra.mxu1 %v1744_v2  ;;  %v1757_v14 = vld [vmem:[%s2629_s30 + $0x30] sm:$0xff]   ;;  %v2387_v17 = vld [vmem:[%s2630_s5 + $0x8] sm:$0xff]  ;;  %v1758_v18 = vld [vmem:[%s2629_s30 + $0x38] sm:$0xff]   ;;  %s2634_s30 = sld [smem:[#allocation30_spill]]  ;;  %p2018_p13 = scmp.ne.s32.totalorder %s1388_s6, %s2017_s9 }
  0xb8   :  { %1594 = vmatprep.subr.bf16.mxu1 %v2088_v1  ;;  %1573 = vmatpush3.bf16.msra.mxu0 %v1747_v4  ;;  %v200_v19 = vpack.c.bf16 %v2387_v17, %v2382_v16  ;;  %v1427_v20 = vld [vmem:[%s2631_s29] ss:$0 sm:$0xff]  ;;  %v1760_v37 = vld [vmem:[%s2633_s4 + $0x8] sm:$0xff]   ;;  %v1761_v38 = vld [vmem:[%s2633_s4 + $0x10] sm:$0xff]   ;;  %s1486_s29 = sld [smem:[#allocation17 + $0x1]]  ;;  %p2023_p1 = scmp.lt.s32.totalorder %s2017_s9, %s2017_s9 }
  0xb9   :  { %1574 = vmatprep.subr.bf16.mxu0 %v2088_v1  ;;  %v1418_v22 = vld [vmem:[%s2632_s20] ss:$0 sm:$0xff]  ;;  %v1762_v39 = vld [vmem:[%s2633_s4 + $0x18] sm:$0xff]   ;;  %v1764_v41 = vld [vmem:[%s2633_s4 + $0x28] sm:$0xff]   ;;  %s1489_s20 = sld [smem:[#allocation17 + $0x4]] }
  0xba   :  { %v1759_v36 = vld [vmem:[%s2633_s4] sm:$0xff]   ;;  %v1765_v42 = vld [vmem:[%s2633_s4 + $0x30] sm:$0xff]   ;;  %v1766_v43 = vld [vmem:[%s2633_s4 + $0x38] sm:$0xff]   ;;  %p2024_p2 = por %p2023_p1, %p2022_p0 }
  0xbb   :  { %1595 = vmatpush3.bf16.msra.mxu1 %v1746_v5  ;;  %v1763_v40 = vld [vmem:[%s2633_s4 + $0x20] sm:$0xff]   ;;  %s2540_s4 = sld [smem:[#allocation17 + $0xa]] }
  0xbc   :  { %1596 = vmatprep.subr.bf16.mxu1 %v2088_v1  ;;  %1575 = vmatpush3.bf16.msra.mxu0 %v1749_v6  ;;  %v1436_v6 = vld [vmem:[#allocation2] ss:$0 sm:$0xff]  ;;  %p2025_p3 = pnand %p2024_p2, %p2018_p13 }
  0xbd   :  { %1576 = vmatprep.subr.bf16.mxu0 %v2088_v1  ;;  %v187_v45 = vld [vmem:[%s2634_s30] sm:$0xff]  ;;  %v188_v49 = vld [vmem:[%s2634_s30 + $0x8] sm:$0xff]  ;;  %s1238_s30 = sld [smem:[#allocation17]] }
  0xbf   :  { %1597 = vmatpush3.bf16.msra.mxu1 %v1748_v7 }
  0xc0   :  { %1598 = vmatprep.subr.bf16.mxu1 %v2088_v1  ;;  %1577 = vmatpush3.bf16.msra.mxu0 %v1751_v8 }
  0xc1   :  { %1578 = vmatprep.subr.bf16.mxu0 %v2088_v1 }
  0xc3   :  { %1599 = vmatpush3.bf16.msra.mxu1 %v1750_v9 }
  0xc4   :  { %1600 = vmatprep.subr.bf16.mxu1 %v2088_v1  ;;  %1579 = vmatpush3.bf16.msra.mxu0 %v1753_v11 }
  0xc5   :  { %1580 = vmatprep.subr.bf16.mxu0 %v2088_v1 }
  0xc7   :  { %1601 = vmatpush3.bf16.msra.mxu1 %v1752_v10 }
  0xc8   :  { %1602 = vmatprep.subr.bf16.mxu1 %v2088_v1  ;;  %1581 = vmatpush3.bf16.msra.mxu0 %v1755_v12 }
  0xc9   :  { %1582 = vmatprep.subr.bf16.mxu0 %v2088_v1 }
  0xcb   :  { %1603 = vmatpush3.bf16.msra.mxu1 %v1754_v13 }
  0xcc   :  { %1604 = vmatprep.subr.bf16.mxu1 %v2088_v1  ;;  %1583 = vmatpush3.bf16.msra.mxu0 %v1757_v14 }
  0xcd   :  { %1584 = vmatprep.subr.bf16.mxu0 %v2088_v1 }
  0xcf   :  { %1605 = vmatpush3.bf16.msra.mxu1 %v1756_v15 }
  0xd0   :  { %1630 = vmatprep.subr.bf16.mxu1 %v2088_v1  ;;  %1585 = vmatpush3.bf16.msra.mxu0 %v1758_v18 }
  0xd1   :  { %1610 = vmatprep.subr.bf16.mxu0 %v2088_v1 }
  0xd2   :  { %1607 = vmatmul.mubr.bf16.vlgmr.msra.gmra.mrb[0].mxu1 %v200_v19 }
  0xd3   :  { %1632 = vmatprep.mubr.msk.bf16.mxu1 %vm2089_vm0, %v2088_v1  ;;  %1587 = vmatmul.mubr.bf16.vlgmr.msra.gmra.mrb[0].mxu0 %v200_v19 }
  0xd4   :  { %1626 = vmatprep.mubr.msk.bf16.mxu0 %vm2089_vm0, %v2088_v1  ;;  %1611 = vmatpush3.bf16.msra.mxu0 %v1759_v36 }
  0xd5   :  { %1612 = vmatprep.subr.bf16.mxu0 %v2088_v1 }
  0xd8   :  { %1613 = vmatpush3.bf16.msra.mxu0 %v1760_v37 }
  0xd9   :  { %1614 = vmatprep.subr.bf16.mxu0 %v2088_v1 }
  0xdc   :  { %1615 = vmatpush3.bf16.msra.mxu0 %v1761_v38 }
  0xdd   :  { %1616 = vmatprep.subr.bf16.mxu0 %v2088_v1 }
  0xe0   :  { %1617 = vmatpush3.bf16.msra.mxu0 %v1762_v39 }
  0xe1   :  { %1618 = vmatprep.subr.bf16.mxu0 %v2088_v1 }
  0xe4   :  { %1619 = vmatpush3.bf16.msra.mxu0 %v1763_v40 }
  0xe5   :  { %1620 = vmatprep.subr.bf16.mxu0 %v2088_v1 }
  0xe8   :  { %1621 = vmatpush3.bf16.msra.mxu0 %v1764_v41 }
  0xe9   :  { %1622 = vmatprep.subr.bf16.mxu0 %v2088_v1 }
  0xec   :  { %1623 = vmatpush3.bf16.msra.mxu0 %v1765_v42 }
  0xed   :  { %1624 = vmatprep.subr.bf16.mxu0 %v2088_v1 }
  0xf0   :  { %1625 = vmatpush3.bf16.msra.mxu0 %v1766_v43 }
  0xf1   :  { %1662 = vmatprep.subr.bf16.mxu0 %v2088_v1 }
  0xf3   :  { %1627 = vmatmul.mubr.bf16.vlgmr.msra.gmra.mrb[4].mxu0 %v200_v19  ;;  %v1767_v19 = vld [vmem:[%s2601_s8] sm:$0xff]  }
  0xf4   :  { %1678 = vmatprep.mubr.msk.bf16.mxu0 %vm2089_vm0, %v2088_v1 }
 0x1a5   :  { %v416_v21 = vpop.f32.mrb[0].mxu1 }
 0x1a6   :  { %v1608_v23 = vpop.f32.mrb[1].mxu1  ;;  %v305_v25 = vpop.f32.mrb[0].mxu0  ;;  %v417_v26 = vadd.f32 %v1427_v20, %v416_v21  ;;  %v1768_v21 = vld [vmem:[%s2601_s8 + $0x8] sm:$0xff]  }
 0x1a7   :  { %v419_v24 = vpop.f32.mrb[2].mxu1  ;;  %v306_v29 = vadd.f32 %v1418_v22, %v305_v25  ;;  %v1588_v30 = vpop.f32.mrb[1].mxu0  ;;  %v1770_v23 = vld [vmem:[%s2601_s8 + $0x18] sm:$0xff]   ;;  %v1772_v25 = vld [vmem:[%s2601_s8 + $0x28] sm:$0xff]  }
 0x1a8   :  { %v420_v27 = vadd.f32 %v1427_v20, %v419_v24  ;;  %v1609_v28 = vpop.f32.mrb[3].mxu1  ;;  %v308_v31 = vpop.f32.mrb[2].mxu0  ;;  %v1771_v24 = vld [vmem:[%s2601_s8 + $0x20] sm:$0xff]  }
 0x1a9   :  { %v309_v33 = vadd.f32 %v1418_v22, %v308_v31  ;;  %v1589_v34 = vpop.f32.mrb[3].mxu0  ;;  %v1769_v22 = vld [vmem:[%s2601_s8 + $0x10] sm:$0xff]  }
 0x1aa   :  { %v535_v32 = vpack.c.bf16 %v420_v27, %v417_v26  ;;  %v1773_v26 = vld [vmem:[%s2601_s8 + $0x30] sm:$0xff]   ;;  %v1774_v27 = vld [vmem:[%s2601_s8 + $0x38] sm:$0xff]  }
 0x1ab   :  { %v534_v35 = vpack.c.bf16 %v309_v33, %v306_v29  ;;  %v1446_v33 = vld [vmem:[#allocation6] ss:$0 sm:$0xff] }
 0x1ac   :  { %1631 = vmatpush3.bf16.xpose.msra.mxu1 %v535_v32 }
 0x1ad   :  { %1636 = vmatprep.subr.bf16.mxu1 %v2088_v1 }
 0x1b3   :  { %1633 = vmatmul.mubr.bf16.vlgmr.msra.gmra.mrb[4].mxu1 %v534_v35 }
 0x1b4   :  { %1638 = vmatprep.mubr.msk.bf16.mxu1 %vm2089_vm0, %v2088_v1 }
 0x1c6   :  { %v527_v3 = vpop.f32.mrb[4].mxu0 }
 0x1c7   :  { %v1628_v4 = vpop.f32.mrb[5].mxu0  ;;  %v528_v8 = vadd.f32 %v1436_v6, %v527_v3  ;;  %v1455_v3 = vld [vmem:[%s2603_s10] ss:$0 sm:$0xff] }
 0x1c8   :  { %v530_v5 = vpop.f32.mrb[6].mxu0 }
 0x1c9   :  { %v1629_v7 = vpop.f32.mrb[7].mxu0  ;;  %v531_v9 = vadd.f32 %v1436_v6, %v530_v5 }
 0x1cb   :  { %v605_v10 = vpack.c.bf16 %v531_v9, %v528_v8  ;;  %v1456_v9 = vld [vmem:[%s2604_s11] ss:$0 sm:$0xff] }
 0x1cd   :  { %1637 = vmatpush3.bf16.msra.mxu1 %v605_v10 }
 0x1ce   :  { %1642 = vmatprep.subr.bf16.mxu1 %v2088_v1 }
 0x286   :  { %v570_v44 = vpop.f32.mrb[4].mxu1 }
 0x287   :  { %v577_v46 = vmul.f32 0.17677669, %v570_v44  ;;  %v1634_v47 = vpop.f32.mrb[5].mxu1  ;;  %v1775_v44 = vld [vmem:[#allocation8] sm:$0xff]  }
 0x288   :  { %v573_v48 = vpop.f32.mrb[6].mxu1  ;;  %1663 = vmatpush3.bf16.msra.mxu0 %v1775_v44  ;;  %v1780_v47 = vld [vmem:[#allocation8 + $0x28] sm:$0xff]  }
 0x289   :  { %v578_v50 = vmul.f32 0.17677669, %v573_v48  ;;  %v1635_v51 = vpop.f32.mrb[7].mxu1  ;;  %v579_v52 = vadd.f32 %v577_v46, %v187_v45  ;;  %1664 = vmatprep.subr.bf16.mxu0 %v2088_v1  ;;  %v1776_v45 = vld [vmem:[#allocation8 + $0x8] sm:$0xff]   ;;  %v1777_v46 = vld [vmem:[#allocation8 + $0x10] sm:$0xff]  }
 0x28a   :  { %v1781_v48 = vld [vmem:[#allocation8 + $0x30] sm:$0xff]  }
 0x28b   :  { %v582_v53 = vsel %vm581_vm1, %v579_v52, -inf  ;;  %v580_v54 = vadd.f32 %v578_v50, %v188_v49  ;;  %v1782_v49 = vld [vmem:[#allocation8 + $0x38] sm:$0xff]  }
 0x28c   :  { %583 = vmax.xlane.f32.xlu0 %v582_v53  ;;  %1665 = vmatpush3.bf16.msra.mxu0 %v1776_v45 }
 0x28d   :  { %v585_v55 = vsel %vm581_vm1, %v580_v54, -inf  ;;  %1666 = vmatprep.subr.bf16.mxu0 %v2088_v1 }
 0x290   :  { %586 = vmax.xlane.f32.xlu0 %v585_v55  ;;  %1667 = vmatpush3.bf16.msra.mxu0 %v1777_v46 }
 0x291   :  { %1668 = vmatprep.subr.bf16.mxu0 %v2088_v1 }
 0x319   :  { %v584_v56 = vpop.xlane.xlu0 %583 }
 0x31a   :  { %v588_v57 = vsub.f32 %v579_v52, %v584_v56 }
 0x31c   :  { %v590_v58 = vmul.f32 1.442695, %v588_v57 }
 0x31d   :  { %v587_v59 = vpop.xlane.xlu0 %586 }
 0x31e   :  { %1799 = vpow2.f32 %v590_v58  ;;  %v589_v60 = vsub.f32 %v580_v54, %v587_v59 }
 0x320   :  { %v592_v61 = vmul.f32 1.442695, %v589_v60 }
 0x322   :  { %1801 = vpow2.f32 %v592_v61 }
 0x328   :  { %v1800_v62 = vpop.eup %1799 }
 0x329   :  { %v594_v63 = vsel %vm581_vm1, %v1800_v62, 0.0 }
 0x32a   :  { %595 = vadd.xlane.f32.xlu1 %v594_v63 }
 0x32c   :  { %v1802_v0 = vpop.eup %1801 }
 0x32d   :  { %v597_v2 = vsel %vm581_vm1, %v1802_v0, 0.0 }
 0x32e   :  { %598 = vadd.xlane.f32.xlu1 %v597_v2 }
 0x3b7   :  { %v596_v11 = vpop.xlane.xlu1 %595 }
 0x3b8   :  { %1803 = vrcp.f32 %v596_v11 }
 0x3bb   :  { %v599_v12 = vpop.xlane.xlu1 %598 }
 0x3bc   :  { %1805 = vrcp.f32 %v599_v12 }
 0x3c2   :  { %v1804_v13 = vpop.eup %1803 }
 0x3c3   :  { %v602_v15 = vmul.f32 %v1804_v13, %v1800_v62 }
 0x3c6   :  { %v1806_v14 = vpop.eup %1805 }
 0x3c7   :  { %v603_v18 = vmul.f32 %v1806_v14, %v1802_v0  ;;  %v1783_v14 = vld [vmem:[#allocation11] sm:$0xff]  }
 0x3c9   :  { %v604_v20 = vpack.c.bf16 %v603_v18, %v602_v15  ;;  %v1784_v15 = vld [vmem:[#allocation11 + $0x8] sm:$0xff]   ;;  %v1785_v18 = vld [vmem:[#allocation11 + $0x10] sm:$0xff]  }
 0x3cb   :  { %1639 = vmatmul.mubr.msk.bf16.vlgmr.msra.gmra.mrb[8].mxu1 %vm581_vm1, %v604_v20  ;;  %v1787_v20 = vld [vmem:[#allocation11 + $0x20] sm:$0xff]  }
 0x3cc   :  { %1643 = vmatpush3.bf16.msra.mxu1 %v1767_v19  ;;  %1658 = vmatprep.mubr.msk.bf16.mxu1 %vm2089_vm0, %v2088_v1  ;;  %v1786_v19 = vld [vmem:[#allocation11 + $0x18] sm:$0xff]  }
 0x3cd   :  { %1644 = vmatprep.subr.bf16.mxu1 %v2088_v1 }
 0x3d0   :  { %1645 = vmatpush3.bf16.msra.mxu1 %v1768_v21  ;;  %v1788_v21 = vld [vmem:[#allocation11 + $0x28] sm:$0xff]  }
 0x3d1   :  { %1646 = vmatprep.subr.bf16.mxu1 %v2088_v1 }
 0x3d4   :  { %1647 = vmatpush3.bf16.msra.mxu1 %v1769_v22  ;;  %v1789_v22 = vld [vmem:[#allocation11 + $0x30] sm:$0xff]  }
 0x3d5   :  { %1648 = vmatprep.subr.bf16.mxu1 %v2088_v1 }
 0x3d8   :  { %1649 = vmatpush3.bf16.msra.mxu1 %v1770_v23  ;;  %v1790_v23 = vld [vmem:[#allocation11 + $0x38] sm:$0xff]  }
 0x3d9   :  { %1650 = vmatprep.subr.bf16.mxu1 %v2088_v1 }
 0x3dc   :  { %1651 = vmatpush3.bf16.msra.mxu1 %v1771_v24  ;;  %v1457_v24 = vld [vmem:[#allocation9] ss:$0 sm:$0xff] }
 0x3dd   :  { %1652 = vmatprep.subr.bf16.mxu1 %v2088_v1 }
 0x3e0   :  { %1653 = vmatpush3.bf16.msra.mxu1 %v1772_v25 }
 0x3e1   :  { %1654 = vmatprep.subr.bf16.mxu1 %v2088_v1 }
 0x3e4   :  { %1655 = vmatpush3.bf16.msra.mxu1 %v1773_v26 }
 0x3e5   :  { %1656 = vmatprep.subr.bf16.mxu1 %v2088_v1 }
 0x3e8   :  { %1657 = vmatpush3.bf16.msra.mxu1 %v1774_v27 }
 0x3e9   :  { %1682 = vmatprep.subr.bf16.mxu1 %v2088_v1 }
 0x49e   :  { %v643_v28 = vpop.f32.mrb[8].mxu1 }
 0x49f   :  { %v1640_v29 = vpop.f32.mrb[9].mxu1 }
 0x4a0   :  { %v646_v30 = vpop.f32.mrb[10].mxu1 }
 0x4a1   :  { %v650_v31 = vpack.c.bf16 %v646_v30, %v643_v28  ;;  %v1641_v32 = vpop.f32.mrb[11].mxu1 }
 0x4a3   :  { %1659 = vmatmul.mubr.bf16.vlgmr.msra.gmra.mrb[12].mxu1 %v650_v31 }
 0x4a4   :  { %1698 = vmatprep.mubr.msk.bf16.mxu1 %vm2089_vm0, %v2088_v1  ;;  %1683 = vmatpush3.bf16.msra.mxu1 %v1783_v14 }
 0x4a5   :  { %1684 = vmatprep.subr.bf16.mxu1 %v2088_v1 }
 0x4a8   :  { %1685 = vmatpush3.bf16.msra.mxu1 %v1784_v15 }
 0x4a9   :  { %1686 = vmatprep.subr.bf16.mxu1 %v2088_v1 }
 0x4ac   :  { %1687 = vmatpush3.bf16.msra.mxu1 %v1785_v18 }
 0x4ad   :  { %1688 = vmatprep.subr.bf16.mxu1 %v2088_v1 }
 0x4b0   :  { %1689 = vmatpush3.bf16.msra.mxu1 %v1786_v19 }
 0x4b1   :  { %1690 = vmatprep.subr.bf16.mxu1 %v2088_v1 }
 0x4b4   :  { %1691 = vmatpush3.bf16.msra.mxu1 %v1787_v20 }
 0x4b5   :  { %1692 = vmatprep.subr.bf16.mxu1 %v2088_v1 }
 0x4b8   :  { %1693 = vmatpush3.bf16.msra.mxu1 %v1788_v21 }
 0x4b9   :  { %1694 = vmatprep.subr.bf16.mxu1 %v2088_v1 }
 0x4bc   :  { %1695 = vmatpush3.bf16.msra.mxu1 %v1789_v22  ;;  %v1475_v22 = vld [vmem:[%s2609_s16] ss:$0 sm:$0xff]  ;;  %s1488_s16 = sld [smem:[#allocation17 + $0x3]] }
 0x4bd   :  { %1696 = vmatprep.subr.bf16.mxu1 %v2088_v1 }
 0x4c0   :  { %1697 = vmatpush3.bf16.msra.mxu1 %v1790_v23 }
 0x576   :  { %v755_v34 = vpop.f32.mrb[12].mxu1 }
 0x577   :  { %v756_v35 = vadd.f32 %v1446_v33, %v755_v34  ;;  %v1660_v36 = vpop.f32.mrb[13].mxu1 }
 0x578   :  { %v758_v37 = vpop.f32.mrb[14].mxu1 }
 0x579   :  { %v762_v38 = vadd.f32 %v756_v35, %v2382_v16  ;;  %v759_v39 = vadd.f32 %v1446_v33, %v758_v37  ;;  %v1661_v40 = vpop.f32.mrb[15].mxu1  ;;  %v1778_v16 = vld [vmem:[#allocation8 + $0x18] sm:$0xff]  }
 0x57a   :  { %1669 = vmatpush3.bf16.msra.mxu0 %v1778_v16 }
 0x57b   :  { %v763_v41 = vadd.f32 %v759_v39, %v2387_v17  ;;  %764 = vadd.xlane.f32.xlu0 %v762_v38  ;;  %v770_v42 = vmul.f32 %v762_v38, %v762_v38  ;;  %v1779_v17 = vld [vmem:[#allocation8 + $0x20] sm:$0xff]   ;;  %1670 = vmatprep.subr.bf16.mxu0 %v2088_v1 }
 0x57d   :  { %766 = vadd.xlane.f32.xlu1 %v763_v41  ;;  %v771_v43 = vmul.f32 %v763_v41, %v763_v41 }
 0x57e   :  { %1671 = vmatpush3.bf16.msra.mxu0 %v1779_v17 }
 0x57f   :  { %772 = vadd.xlane.f32.xlu0 %v770_v42  ;;  %1672 = vmatprep.subr.bf16.mxu0 %v2088_v1 }
 0x581   :  { %774 = vadd.xlane.f32.xlu1 %v771_v43 }
 0x582   :  { %1673 = vmatpush3.bf16.msra.mxu0 %v1780_v47 }
 0x583   :  { %1674 = vmatprep.subr.bf16.mxu0 %v2088_v1 }
 0x586   :  { %1675 = vmatpush3.bf16.msra.mxu0 %v1781_v48  ;;  %v1474_v48 = vld [vmem:[#allocation12] ss:$0 sm:$0xff] }
 0x587   :  { %1676 = vmatprep.subr.bf16.mxu0 %v2088_v1 }
 0x58a   :  { %1677 = vmatpush3.bf16.msra.mxu0 %v1782_v49 }
 0x58b   :  { %1702 = vmatprep.subr.bf16.mxu0 %v2088_v1 }
 0x608   :  { %v765_v50 = vpop.xlane.xlu0 %764 }
 0x609   :  { %v768_v51 = vmul.f32 0.03125, %v765_v50 }
 0x60a   :  { %v767_v52 = vpop.xlane.xlu1 %766 }
 0x60b   :  { %v769_v53 = vmul.f32 0.03125, %v767_v52  ;;  %v778_v55 = vmul.f32 %v768_v51, %v768_v51  ;;  %v782_v0 = vsub.f32 %v762_v38, %v768_v51 }
 0x60c   :  { %v773_v54 = vpop.xlane.xlu0 %772 }
 0x60d   :  { %v776_v56 = vmul.f32 0.03125, %v773_v54  ;;  %v779_v58 = vmul.f32 %v769_v53, %v769_v53  ;;  %v783_v4 = vsub.f32 %v763_v41, %v769_v53 }
 0x60e   :  { %v775_v57 = vpop.xlane.xlu1 %774 }
 0x60f   :  { %v780_v59 = vsub.f32 %v776_v56, %v778_v55  ;;  %v777_v60 = vmul.f32 0.03125, %v775_v57 }
 0x611   :  { %v784_v61 = vadd.f32 1e-12, %v780_v59  ;;  %v781_v62 = vsub.f32 %v777_v60, %v779_v58  ;;  %v1791_v59 = vld [vmem:[#allocation14] sm:$0xff]   ;;  %v1792_v60 = vld [vmem:[#allocation14 + $0x8] sm:$0xff]  }
 0x613   :  { %1807 = vrsqrt.f32 %v784_v61  ;;  %v785_v63 = vadd.f32 1e-12, %v781_v62  ;;  %v1793_v61 = vld [vmem:[#allocation14 + $0x10] sm:$0xff]   ;;  %v1794_v62 = vld [vmem:[#allocation14 + $0x18] sm:$0xff]  }
 0x615   :  { %1809 = vrsqrt.f32 %v785_v63  ;;  %v1795_v63 = vld [vmem:[#allocation14 + $0x20] sm:$0xff]  }
 0x61d   :  { %v1808_v2 = vpop.eup %1807 }
 0x61e   :  { %v788_v5 = vmul.f32 %v1808_v2, %v782_v0  ;;  %v1796_v0 = vld [vmem:[#allocation14 + $0x28] sm:$0xff]   ;;  %v1797_v2 = vld [vmem:[#allocation14 + $0x30] sm:$0xff]  }
 0x61f   :  { %v1810_v6 = vpop.eup %1809 }
 0x620   :  { %v789_v7 = vmul.f32 %v1810_v6, %v783_v4  ;;  %v796_v8 = vmul.f32 %v1455_v3, %v788_v5 }
 0x622   :  { %v797_v10 = vmul.f32 %v1455_v3, %v789_v7  ;;  %v804_v11 = vadd.f32 %v1456_v9, %v796_v8  ;;  %v1798_v3 = vld [vmem:[#allocation14 + $0x38] sm:$0xff]  }
 0x624   :  { %v805_v12 = vadd.f32 %v1456_v9, %v797_v10 }
 0x626   :  { %v806_v13 = vpack.c.bf16 %v805_v12, %v804_v11 }
 0x628   :  { %1679 = vmatmul.mubr.bf16.vlgmr.msra.gmra.mrb[8].mxu0 %v806_v13 }
 0x629   :  { %1718 = vmatprep.mubr.msk.bf16.mxu0 %vm2089_vm0, %v2088_v1  ;;  %1703 = vmatpush3.bf16.msra.mxu0 %v1791_v59 }
 0x62a   :  { %1704 = vmatprep.subr.bf16.mxu0 %v2088_v1 }
 0x62d   :  { %1705 = vmatpush3.bf16.msra.mxu0 %v1792_v60  ;;  %v1317_v60 = vstv %s2547_s14 }
 0x62e   :  { %1706 = vmatprep.subr.bf16.mxu0 %v2088_v1 }
 0x631   :  { %1707 = vmatpush3.bf16.msra.mxu0 %v1793_v61  ;;  %v1323_v61 = vstv %s2549_s0 }
 0x632   :  { %1708 = vmatprep.subr.bf16.mxu0 %v2088_v1 }
 0x635   :  { %1709 = vmatpush3.bf16.msra.mxu0 %v1794_v62 }
 0x636   :  { %1710 = vmatprep.subr.bf16.mxu0 %v2088_v1 }
 0x639   :  { %1711 = vmatpush3.bf16.msra.mxu0 %v1795_v63  ;;  %v1329_v63 = vstv %s2551_s13 }
 0x63a   :  { %1712 = vmatprep.subr.bf16.mxu0 %v2088_v1 }
 0x63d   :  { %1713 = vmatpush3.bf16.msra.mxu0 %v1796_v0 }
 0x63e   :  { %1714 = vmatprep.subr.bf16.mxu0 %v2088_v1 }
 0x641   :  { %1715 = vmatpush3.bf16.msra.mxu0 %v1797_v2 }
 0x642   :  { %1716 = vmatprep.subr.bf16.mxu0 %v2088_v1 }
 0x645   :  { %1717 = vmatpush3.bf16.msra.mxu0 %v1798_v3 }
 0x6fb   :  { %v911_v25 = vpop.f32.mrb[8].mxu0 }
 0x6fc   :  { %v912_v26 = vadd.f32 %v1457_v24, %v911_v25  ;;  %v1680_v27 = vpop.f32.mrb[9].mxu0 }
 0x6fd   :  { %v914_v28 = vpop.f32.mrb[10].mxu0 }
 0x6fe   :  { %v918_v29 = vmul.f32 %v912_v26, %v912_v26  ;;  %v915_v30 = vadd.f32 %v1457_v24, %v914_v28  ;;  %v1681_v31 = vpop.f32.mrb[11].mxu0  ;;  %v1476_v28 = vld [vmem:[%s2610_s17] ss:$0 sm:$0xff]  ;;  %s2538_s17 = sld [smem:[#allocation17 + $0x6]] }
 0x700   :  { %v920_v32 = vmul.f32 %v918_v29, %v912_v26  ;;  %v919_v33 = vmul.f32 %v915_v30, %v915_v30 }
 0x702   :  { %v922_v34 = vmul.f32 0.044715, %v920_v32  ;;  %v921_v35 = vmul.f32 %v919_v33, %v915_v30  ;;  %v1208_v33 = vlaneseq }
 0x704   :  { %v924_v36 = vadd.f32 %v922_v34, %v912_v26  ;;  %v923_v37 = vmul.f32 0.044715, %v921_v35  ;;  %v1234_v34 = vshrl.u32 %v1208_v33, 7  ;;  %v1239_v35 = vstv %s1238_s30 }
 0x706   :  { %v926_v38 = vmul.f32 0.7978846, %v924_v36  ;;  %v925_v39 = vadd.f32 %v923_v37, %v915_v30  ;;  %vm1236_vm2 = vcmp.eq.s32.totalorder %v1234_v34, 0  ;;  %v1235_v36 = vadd.s32 8, %v1234_v34 }
 0x707   :  { %v1240_v37 = vsel %vm1236_vm2, %v1239_v35, 4294967295  ;;  %vm1242_vm3 = vcmp.eq.s32.totalorder %v1234_v34, 1  ;;  %vm1248_vm4 = vcmp.eq.s32.totalorder %v1234_v34, 2  ;;  %vm1254_vm6 = vcmp.eq.s32.totalorder %v1234_v34, 3 }
 0x708   :  { %1811 = vtanh.f32 %v926_v38  ;;  %v927_v40 = vmul.f32 0.7978846, %v925_v39  ;;  %v1245_v38 = vstv %s1486_s29  ;;  %vm1285_vm5 = vcmp.eq.s32.totalorder %v1235_v36, 8 }
 0x709   :  { %v1246_v39 = vsel %vm1242_vm3, %v1245_v38, %v1240_v37  ;;  %vm1260_vm7 = vcmp.eq.s32.totalorder %v1234_v34, 4  ;;  %vm1266_vm8 = vcmp.eq.s32.totalorder %v1234_v34, 5  ;;  %vm1291_vm9 = vcmp.eq.s32.totalorder %v1235_v36, 9 }
 0x70a   :  { %1813 = vtanh.f32 %v927_v40  ;;  %v1251_v40 = vstv %s1487_s18  ;;  %vm1272_vm10 = vcmp.eq.s32.totalorder %v1234_v34, 6  ;;  %vm1278_vm11 = vcmp.eq.s32.totalorder %v1234_v34, 7 }
 0x70b   :  { %vm1297_vm12 = vcmp.eq.s32.totalorder %v1235_v36, 10  ;;  %vm1303_vm14 = vcmp.eq.s32.totalorder %v1235_v36, 11  ;;  %vm1309_vm15 = vcmp.eq.s32.totalorder %v1235_v36, 12  ;;  %vm1315_vm0 = vcmp.eq.s32.totalorder %v1235_v36, 13 }
 0x70c   :  { %vm1321_vm1 = vcmp.eq.s32.totalorder %v1235_v36, 14  ;;  %vm1327_vm2 = vcmp.eq.s32.totalorder %v1235_v36, 15 }
 0x712   :  { %v1812_v41 = vpop.eup %1811 }
 0x713   :  { %v930_v42 = vadd.f32 1.0, %v1812_v41  ;;  %v1252_v41 = vsel %vm1248_vm4, %v1251_v40, %v1246_v39 }
 0x714   :  { %v1814_v43 = vpop.eup %1813 }
 0x715   :  { %v932_v44 = vmul.f32 0.5, %v930_v42  ;;  %v931_v45 = vadd.f32 1.0, %v1814_v43  ;;  %v1257_v42 = vstv %s1488_s16  ;;  %v1287_v43 = vstv %s2532_s7 }
 0x717   :  { %v933_v46 = vmul.f32 0.5, %v931_v45  ;;  %v934_v16 = vmul.f32 %v932_v44, %v912_v26  ;;  %v1258_v44 = vsel %vm1254_vm6, %v1257_v42, %v1252_v41  ;;  %v1263_v45 = vstv %s1489_s20 }
 0x719   :  { %v935_v17 = vmul.f32 %v933_v46, %v915_v30  ;;  %v1289_v46 = vsel %vm1285_vm5, %v1287_v43, 4294967295 }
 0x71b   :  { %v936_v47 = vpack.c.bf16 %v935_v17, %v934_v16  ;;  %v1264_v16 = vsel %vm1260_vm7, %v1263_v45, %v1258_v44  ;;  %v1269_v17 = vstv %s2536_s15  ;;  %vm1350_vm7 = vcmask 7168  }
 0x71d   :  { %1699 = vmatmul.mubr.bf16.vlgmr.msra.gmra.mrb[16].mxu1 %v936_v47  ;;  %v1270_v47 = vsel %vm1266_vm8, %v1269_v17, %v1264_v16 }
 0x7f0   :  { %v1035_v49 = vpop.f32.mrb[16].mxu1 }
 0x7f1   :  { %v1042_v50 = vadd.f32 %v1035_v49, %v804_v11  ;;  %v1700_v51 = vpop.f32.mrb[17].mxu1  ;;  %v1293_v49 = vstv %s2534_s27 }
 0x7f2   :  { %v1038_v52 = vpop.f32.mrb[18].mxu1 }
 0x7f3   :  { %v1050_v53 = vadd.f32 %v1474_v48, %v1042_v50  ;;  %v1043_v54 = vadd.f32 %v1038_v52, %v805_v12  ;;  %v1701_v55 = vpop.f32.mrb[19].mxu1  ;;  %v1209_v50 = vand.u32 127, %v1208_v33  ;;  %v1281_v52 = vstv %s1492_s19 }
 0x7f4   :  { %v1299_v55 = vstv %s2540_s4 }
 0x7f5   :  { %v1051_v56 = vadd.f32 %v1474_v48, %v1043_v54  ;;  %1052 = vadd.xlane.f32.xlu0 %v1050_v53  ;;  %v1058_v57 = vmul.f32 %v1050_v53, %v1050_v53  ;;  %v1275_v48 = vstv %s2538_s17  ;;  %v1295_v54 = vsel %vm1291_vm9, %v1293_v49, %v1289_v46 }
 0x7f6   :  { %v1276_v51 = vsel %vm1272_vm10, %v1275_v48, %v1270_v47  ;;  %vm1210_vm4 = vcmp.lt.s32.totalorder %v1209_v50, 9 }
 0x7f7   :  { %1054 = vadd.xlane.f32.xlu1 %v1051_v56  ;;  %v1059_v58 = vmul.f32 %v1051_v56, %v1051_v56 }
 0x7f9   :  { %1060 = vadd.xlane.f32.xlu0 %v1058_v57  ;;  %v1305_v57 = vstv %s2542_s23 }
 0x7fb   :  { %1062 = vadd.xlane.f32.xlu1 %v1059_v58  ;;  %v1311_v58 = vstv %s2544_s1 }
 0x882   :  { %v1053_v4 = vpop.xlane.xlu0 %1052 }
 0x883   :  { %v1056_v5 = vmul.f32 0.03125, %v1053_v4  ;;  %v1477_v4 = vld [vmem:[#allocation15] ss:$0 sm:$0xff] }
 0x884   :  { %v1055_v6 = vpop.xlane.xlu1 %1054 }
 0x885   :  { %v1057_v7 = vmul.f32 0.03125, %v1055_v6  ;;  %v1066_v9 = vmul.f32 %v1056_v5, %v1056_v5  ;;  %v1070_v20 = vsub.f32 %v1050_v53, %v1056_v5  ;;  %v1282_v53 = vsel %vm1278_vm11, %v1281_v52, %v1276_v51 }
 0x886   :  { %v1061_v8 = vpop.xlane.xlu0 %1060  ;;  %vm1332_vm13 = vcmp.eq.s32.totalorder %v1209_v50, %v1282_v53  ;;  %vm1340_vm5 = vcmp.ne.s32.totalorder %v1282_v53, 4294967295 }
 0x887   :  { %v1064_v10 = vmul.f32 0.03125, %v1061_v8  ;;  %v1067_v12 = vmul.f32 %v1057_v7, %v1057_v7  ;;  %v1071_v23 = vsub.f32 %v1051_v56, %v1057_v7  ;;  %v1301_v56 = vsel %vm1297_vm12, %v1299_v55, %v1295_v54 }
 0x888   :  { %v1063_v11 = vpop.xlane.xlu1 %1062  ;;  %v1307_v59 = vsel %vm1303_vm14, %v1305_v57, %v1301_v56 }
 0x889   :  { %v1068_v13 = vsub.f32 %v1064_v10, %v1066_v9  ;;  %v1065_v14 = vmul.f32 0.03125, %v1063_v11  ;;  %v1313_v62 = vsel %vm1309_vm15, %v1311_v58, %v1307_v59 }
 0x88a   :  { %v1319_v0 = vsel %vm1315_vm0, %v1317_v60, %v1313_v62 }
 0x88b   :  { %v1072_v15 = vadd.f32 1e-12, %v1068_v13  ;;  %v1069_v18 = vsub.f32 %v1065_v14, %v1067_v12  ;;  %v1325_v2 = vsel %vm1321_vm1, %v1323_v61, %v1319_v0 }
 0x88c   :  { %v1331_v3 = vsel %vm1327_vm2, %v1329_v63, %v1325_v2 }
 0x88d   :  { %1815 = vrsqrt.f32 %v1072_v15  ;;  %v1073_v19 = vadd.f32 1e-12, %v1069_v18  ;;  %vm1333_vm3 = vcmp.eq.s32.totalorder %v1209_v50, %v1331_v3  ;;  %vm1341_vm6 = vcmp.ne.s32.totalorder %v1331_v3, 4294967295 }
 0x88f   :  { %1817 = vrsqrt.f32 %v1073_v19 }
 0x897   :  { %v1816_v21 = vpop.eup %1815 }
 0x898   :  { %v1076_v24 = vmul.f32 %v1816_v21, %v1070_v20 }
 0x899   :  { %v1818_v25 = vpop.eup %1817 }
 0x89a   :  { %v1077_v26 = vmul.f32 %v1818_v25, %v1071_v23  ;;  %v1084_v27 = vmul.f32 %v1475_v22, %v1076_v24  ;;  %v1501_v25 = vsel %vm1340_vm5, 1.0, %v2088_v1 }
 0x89c   :  { %v1085_v29 = vmul.f32 %v1475_v22, %v1077_v26  ;;  %v1092_v30 = vadd.f32 %v1476_v28, %v1084_v27  ;;  %v1502_v26 = vsel %vm1341_vm6, 1.0, %v2088_v1  ;;  %v1364_v27 = vsel %vm1350_vm7, %v1501_v25, 0.0 }
 0x89e   :  { %v1093_v31 = vadd.f32 %v1476_v28, %v1085_v29  ;;  %v1365_v28 = vsel %vm1350_vm7, %v1502_v26, 0.0 }
 0x89f   :  { %v1366_v29 = vadd.f32 %v1365_v28, %v1364_v27 }
 0x8a0   :  { %v1094_v32 = vpack.c.bf16 %v1093_v31, %v1092_v30 }
 0x8a2   :  { %1719 = vmatmul.mubr.bf16.vlgmr.msra.gmra.mrb[12].mxu0 %v1094_v32 }
 0x975   :  { %v1199_v5 = vpop.f32.mrb[12].mxu0 }
 0x976   :  { %v1200_v6 = vadd.f32 %v1477_v4, %v1199_v5  ;;  %v1720_v7 = vpop.f32.mrb[13].mxu0 }
 0x977   :  { %v1202_v8 = vpop.f32.mrb[14].mxu0 }
 0x978   :  { %1206 = vst [vmem:[#allocation18] sm:$0xff] %v1200_v6  ;;  %v1203_v9 = vadd.f32 %v1477_v4, %v1202_v8  ;;  %v1721_v10 = vpop.f32.mrb[15].mxu0  ;;  %v1211_v11 = vsel %vm1210_vm4, %v1200_v6, -1e+30  ;;  %v1334_v12 = vsel %vm1332_vm13, %v1200_v6, 0.0 }
 0x979   :  { %1213 = vmax.xlane.f32.xlu0 %v1211_v11 }
 0x97a   :  { %1207 = vst [vmem:[#allocation18 + $0x8] sm:$0xff] %v1203_v9  ;;  %v1212_v13 = vsel %vm1210_vm4, %v1203_v9, -1e+30  ;;  %v1335_v14 = vsel %vm1333_vm3, %v1203_v9, 0.0 }
 0x97b   :  { %1215 = vmax.xlane.f32.xlu1 %v1212_v13 }
 0xa06   :  { %v1214_v15 = vpop.xlane.xlu0 %1213 }
 0xa07   :  { %v1217_v18 = vsub.f32 %v1211_v11, %v1214_v15 }
 0xa08   :  { %v1216_v19 = vpop.xlane.xlu1 %1215 }
 0xa09   :  { %v1219_v20 = vmul.f32 1.442695, %v1217_v18  ;;  %v1218_v21 = vsub.f32 %v1212_v13, %v1216_v19 }
 0xa0b   :  { %1819 = vpow2.f32 %v1219_v20  ;;  %v1221_v22 = vmul.f32 1.442695, %v1218_v21 }
 0xa0d   :  { %1821 = vpow2.f32 %v1221_v22 }
 0xa15   :  { %v1820_v23 = vpop.eup %1819 }
 0xa16   :  { %1223 = vadd.xlane.f32.xlu0 %v1820_v23 }
 0xa17   :  { %v1822_v24 = vpop.eup %1821 }
 0xa18   :  { %1225 = vadd.xlane.f32.xlu1 %v1822_v24 }
 0xa1a   :  { %1336 = vadd.xlane.f32.xlu0 %v1334_v12 }
 0xa1c   :  { %1338 = vadd.xlane.f32.xlu1 %v1335_v14 }
 0xa20   :  { %1367 = vadd.xlane.f32.xlu1 %v1366_v29 }
 0xaa3   :  { %v1224_v30 = vpop.xlane.xlu0 %1223 }
 0xaa4   :  { %1823 = vlog2.f32 %v1224_v30 }
 0xaa5   :  { %v1226_v31 = vpop.xlane.xlu1 %1225 }
 0xaa6   :  { %1825 = vlog2.f32 %v1226_v31 }
 0xaa7   :  { %v1337_v37 = vpop.xlane.xlu0 %1336 }
 0xaa9   :  { %v1339_v1 = vpop.xlane.xlu1 %1338 }
 0xaae   :  { %v1824_v32 = vpop.eup %1823 }
 0xaaf   :  { %v1228_v33 = vmul.f32 0.6931472, %v1824_v32 }
 0xab0   :  { %v1826_v34 = vpop.eup %1825 }
 0xab1   :  { %v1230_v35 = vmul.f32 0.6931472, %v1826_v34  ;;  %v1231_v36 = vadd.f32 %v1228_v33, %v1214_v15 }
 0xab3   :  { %v1346_v38 = vsub.f32 %v1231_v36, %v1337_v37  ;;  %v1232_v39 = vadd.f32 %v1230_v35, %v1216_v19 }
 0xab5   :  { %v1348_v40 = vmul.f32 %v1501_v25, %v1346_v38  ;;  %v1347_v41 = vsub.f32 %v1232_v39, %v1339_v1 }
 0xab7   :  { %v1349_v42 = vmul.f32 %v1502_v26, %v1347_v41  ;;  %v1351_v43 = vsel %vm1350_vm7, %v1348_v40, 0.0 }
 0xab9   :  { %v1352_v44 = vsel %vm1350_vm7, %v1349_v42, 0.0 }
 0xaba   :  { %v1353_v45 = vadd.f32 %v1352_v44, %v1351_v43 }
 0xabc   :  { %1354 = vadd.xlane.f32.xlu0 %v1353_v45 }
 0xabd   :  { %2028 = shalt.err (!%p2025_p3)
}
 0xabe   :  { %s2029_s8 = scalar_lea.hbm %s2614_s21, 256 }
 0xabf   :  { %p2030_p4 = scmp.ne.s32.totalorder %s2614_s21, %s2029_s8  ;;  %p2033_p5 = scmp.lt.u32.totalorder %s2029_s8, %s2614_s21 }
 0xac1   :  { %p2035_p6 = pnand %p2033_p5, %p2030_p4 }
 0xac3   :  { %2038 = shalt.err (!%p2035_p6)
}
 0xac4   :  { %s2091_s11 = smov 128   ;;  %s2092_s3 = smov 8   ;;  %v1368_v46 = vpop.xlane.xlu1 %1367  ;;  %vm1380_vm8 = vcmask 0  }
 0xac5   :  { %1393 = dma.vmem_to_hbm [thread:$0]  %s1388_s6, 256, %s2614_s21, [#allocation4], %s2091_s11, %s2091_s11, %s2092_s3   ;;  %v1369_v16 = vrot.slane %v1368_v46, 4 }
 0xac6   :  { %s2093_s21 = smov [#allocation19]  }
 0xac7   :  { %v1370_v17 = vadd.f32 %v1369_v16, %v1368_v46  ;;  %s1400_s7 = sshll.u32 %s2093_s21, 4  ;;  %s1401_s7 = int_to_ptr.vmem [resolvable:$true] %s1400_s7 }
 0xac8   :  { %s2039_s16 = scalar_lea.vmem %s1401_s7, 16  ;;  %s2043_s20 = scalar_lea.vmem %s1401_s7, 32 }
 0xac9   :  { %v1371_v47 = vrot.slane %v1370_v17, 2  ;;  %p2040_p7 = scmp.ne.s32.totalorder %s1401_s7, %s2039_s16  ;;  %p2044_p8 = scmp.lt.s32.totalorder %s1401_s7, %s1401_s7 }
 0xaca   :  { %p2045_p9 = scmp.lt.s32.totalorder %s2043_s20, %s2039_s16 }
 0xacb   :  { %v1372_v51 = vadd.f32 %v1371_v47, %v1370_v17 }
 0xacc   :  { %p2046_p10 = por %p2045_p9, %p2044_p8 }
 0xacd   :  { %v1373_v54 = vrot.slane %v1372_v51, 1 }
 0xace   :  { %p2047_p11 = pnand %p2046_p10, %p2040_p7 }
 0xacf   :  { %v1374_v57 = vadd.f32 %v1373_v54, %v1372_v51 }
 0xb49   :  { %v1355_v48 = vpop.xlane.xlu0 %1354 }
 0xb4a   :  { %v1356_v49 = vrot.slane %v1355_v48, 4 }
 0xb4c   :  { %v1357_v50 = vadd.f32 %v1356_v49, %v1355_v48 }
 0xb4e   :  { %v1358_v52 = vrot.slane %v1357_v50, 2 }
 0xb50   :  { %v1359_v53 = vadd.f32 %v1358_v52, %v1357_v50 }
 0xb52   :  { %v1360_v55 = vrot.slane %v1359_v53, 1 }
 0xb54   :  { %v1361_v56 = vadd.f32 %v1360_v55, %v1359_v53 }
 0xb56   :  { %1722 = vpush %v1361_v56 }
 0xb57   :  { %1724 = vpush %v1374_v57 }
 0xb87   :  { %s1723_s29 = spop %1722 }
 0xb88   :  { %s1725_s18 = spop %1724  ;;  %v1363_v61 = vstv %s1723_s29 }
 0xb89   :  { %v1376_v58 = vstv %s1725_s18 }
 0xb8a   :  { %v1377_v59 = vmax.f32 %v1376_v58, 1.0 }
 0xb8c   :  { %1827 = vrcp.f32 %v1377_v59 }
 0xb96   :  { %v1828_v60 = vpop.eup %1827 }
 0xb97   :  { %v1379_v62 = vmul.f32 %v1828_v60, %v1363_v61 }
 0xb99   :  { %1381 = vst.msk [vmem:[#allocation19] sm:$0x1] %vm1380_vm8, %v1379_v62 }
 0xb9a   :  { %2050 = shalt.err (!%p2047_p11)
}
 0xb9b   :  { %s2051_s17 = scalar_lea.hbm %s2615_s22, 16 }
 0xb9c   :  { %p2052_p12 = scmp.ne.s32.totalorder %s2615_s22, %s2051_s17  ;;  %p2055_p13 = scmp.lt.u32.totalorder %s2051_s17, %s2615_s22 }
 0xb9e   :  { %p2057_p0 = pnand %p2055_p13, %p2052_p12 }
 0xba0   :  { %2060 = shalt.err (!%p2057_p0)
}
 0xba1   :  { %1403 = dma.vmem_to_hbm [thread:$0]  %s1401_s7, 16, %s2615_s22, [#allocation20]  }
 0xba2   :  { %2073 = dma.done.wait [#allocation4], 256  }
 0xba3   :  { %2074 = vsyncadd [#allocation4], 4294967040 }
 0xba4   :  { %2075 = dma.done.wait [#allocation20], 16  }
 0xba5   :  { %2076 = vsyncadd [#allocation20], 4294967280 }
 0xba6   :  { %1410 = vsyncpa [#allocation3], 1 }
 0xba7   :  { %1411 = vsyncpa [#allocation7], 1 }
 0xba8   :  { %1412 = vsyncpa [#allocation10], 1 }
 0xba9   :  { %1413 = vsyncpa [#allocation13], 1 }
 0xbaa   :  { %1414 = vsyncpa [#allocation16], 1 }
 0xbab   :  { %1415 = vsyncpa [#allocation4], 1 }
 0xbac   :  { %1416 = vsyncpa [#allocation20], 1 }
 0xbad   :  { %1417 = vsyncpa [#allocation5], 1 }

</bundles_post_ra>
